<compile_context>
chip_gen: v6e
topology: v6e:2x2x1
jax: 0.10.0
libtpu: 0.0.40
codegen_flags: <defaults>
</compile_context>

<pallas_src>
import math

import numpy as np

import jax
import jax.numpy as jnp
from jax.experimental import pallas as pl
from jax.experimental.pallas import tpu as pltpu

# ---- model hyper-parameters (small, consistent with the module) ----
D_MODEL = 32
NUM_HEADS = 4
D_K = D_MODEL // NUM_HEADS
D_FF = 64
NUM_LAYERS = 2
VOCAB = 50
NORM_VOCAB = 100
INST_SIZE = 128          # inst_proj output width (chosen lane-dense: 128)
B = 2                    # batch
T = 8                    # sequence length
LN_EPS = 1e-5
SCALE = 1.0 / math.sqrt(D_K)

LANES = 128
BT = B * T                    # 16 query rows
KEYS = B * NUM_HEADS * T      # 64 expanded key columns, ordered (b_k, h, k)

# ---- packed weight slab layout: 6 x (128,128) weight blocks + bias/LN rows per layer ----
R_WQ, R_WK, R_WV, R_WO, R_W1, R_W2 = 0, 128, 256, 384, 512, 640
R_BQ, R_BK, R_BV, R_BO, R_B1, R_B2 = 768, 769, 770, 771, 772, 773
R_G1, R_BE1, R_G2, R_BE2 = 774, 775, 776, 777
W_ROWS = 784                  # multiple of 8 sublanes
P_ROWS = 136                  # inst_proj slab: rows 0:128 weight (logical 32x128), row 128 bias


# ------------------------------------------------------------------
# Pallas kernel: full encoder stack + inst_proj, whole batch, one launch
# ------------------------------------------------------------------
def _layer_norm_padded(x, g, b):
    # x is (BT, 128) with zeros beyond column D_MODEL; stats over the D_MODEL valid columns.
    mu = jnp.sum(x, axis=-1, keepdims=True) * (1.0 / D_MODEL)
    ex2 = jnp.sum(x * x, axis=-1, keepdims=True) * (1.0 / D_MODEL)
    var = ex2 - mu * mu
    # g/b are zero-padded beyond D_MODEL, so the padded columns stay exactly zero.
    return (x - mu) * jax.lax.rsqrt(var + LN_EPS) * g + b


def encoder_stack_kernel(x_ref, mask_ref, rmat_ref, hmask_ref, seg_ref,
                         wbuf_ref, proj_ref, out_ref):
    x = x_ref[...]               # (BT, 128), cols >= D_MODEL are zero
    mask_add = mask_ref[...]     # (BT, KEYS) additive mask: 0 valid / -1e9 padded or cross-batch
    r_mat = rmat_ref[...]        # (KEYS, BT)   row-replication: key col (b,h,k) <- x row (b,k)
    head_mask = hmask_ref[...]   # (KEYS, 128)  1 where feature d belongs to head h of that key col
    seg_mat = seg_ref[...]       # (KEYS, KEYS) 1 where two key cols share the same (b,h) segment

    for l in range(NUM_LAYERS):      # static unroll; all slab reads are full-128-lane unmasked
        wq = wbuf_ref[l, R_WQ:R_WQ + LANES, :]
        wk = wbuf_ref[l, R_WK:R_WK + LANES, :]
        wv = wbuf_ref[l, R_WV:R_WV + LANES, :]
        wo = wbuf_ref[l, R_WO:R_WO + LANES, :]
        w1 = wbuf_ref[l, R_W1:R_W1 + LANES, :]
        w2 = wbuf_ref[l, R_W2:R_W2 + LANES, :]
        bq = wbuf_ref[l, R_BQ:R_BQ + 1, :]
        bk = wbuf_ref[l, R_BK:R_BK + 1, :]
        bv = wbuf_ref[l, R_BV:R_BV + 1, :]
        bo = wbuf_ref[l, R_BO:R_BO + 1, :]
        b1 = wbuf_ref[l, R_B1:R_B1 + 1, :]
        b2 = wbuf_ref[l, R_B2:R_B2 + 1, :]
        g1 = wbuf_ref[l, R_G1:R_G1 + 1, :]
        be1 = wbuf_ref[l, R_BE1:R_BE1 + 1, :]
        g2 = wbuf_ref[l, R_G2:R_G2 + 1, :]
        be2 = wbuf_ref[l, R_BE2:R_BE2 + 1, :]

        # ---- projections (full 128-lane, 1/sqrt(d_k) already folded into wq/bq) ----
        q = jnp.dot(x, wq, preferred_element_type=jnp.float32) + bq     # (BT, 128)
        k = jnp.dot(x, wk, preferred_element_type=jnp.float32) + bk
        v = jnp.dot(x, wv, preferred_element_type=jnp.float32) + bv

        # ---- block-diagonal key/value expansion: one matmul + one mask each ----
        k_em = jnp.dot(r_mat, k, preferred_element_type=jnp.float32) * head_mask   # (KEYS, 128)
        v_em = jnp.dot(r_mat, v, preferred_element_type=jnp.float32) * head_mask   # (KEYS, 128)

        # ---- scores / masked per-head softmax on one 2-D tile ----
        s = jax.lax.dot_general(q, k_em, (((1,), (1,)), ((), ())),
                                preferred_element_type=jnp.float32)     # (BT, KEYS)
        s = s + mask_add
        s = s - jnp.max(s, axis=-1, keepdims=True)    # per-row constant: per-head softmax invariant
        p = jnp.exp(s)                                 # masked entries underflow to exactly 0
        denom = jnp.dot(p, seg_mat, preferred_element_type=jnp.float32)  # per-(b,h) segment sums
        p = p * pl.reciprocal(denom + 1e-9, approx=True)

        # ---- context comes out already head-merged (B*T, D) in cols 0:32 ----
        ctx = jnp.dot(p, v_em, preferred_element_type=jnp.float32)       # (BT, 128)
        attn = jnp.dot(ctx, wo, preferred_element_type=jnp.float32) + bo

        x = _layer_norm_padded(x + attn, g1, be1)      # residual + LayerNorm1 (dropout = id)

        # ---- feed forward ----
        hid = jnp.maximum(jnp.dot(x, w1, preferred_element_type=jnp.float32) + b1, 0.0)
        ff = jnp.dot(hid, w2, preferred_element_type=jnp.float32) + b2
        x = _layer_norm_padded(x + ff, g2, be2)        # residual + LayerNorm2

    # ---- final inst_proj: lane-dense (B*T, 128) output, single unmasked store ----
    w_p = proj_ref[0:LANES, :]
    b_p = proj_ref[LANES:LANES + 1, :]
    out_ref[...] = jnp.dot(x, w_p, preferred_element_type=jnp.float32) + b_p


def encoder_stack_pallas(x_flat, mask_add, r_mat, head_mask, seg_mat, wbuf, proj):
    # No grid: single invocation, whole arrays single-buffered in VMEM (~1 MiB total).
    return pl.pallas_call(
        encoder_stack_kernel,
        out_shape=jax.ShapeDtypeStruct((x_flat.shape[0], INST_SIZE), jnp.float32),
    )(x_flat, mask_add, r_mat, head_mask, seg_mat, wbuf, proj)


# ------------------------------------------------------------------
# Constant attention-relayout matrices (static functions of B, T, H)
# ------------------------------------------------------------------
def build_attention_constants():
    r = np.arange(KEYS)
    # key column r = b*H*T + h*T + k  ->  source x row b*T + k
    src_row = (r // (NUM_HEADS * T)) * T + (r % T)
    r_mat = (src_row[:, None] == np.arange(BT)[None, :]).astype(np.float32)          # (KEYS, BT)
    h_of_r = (r % (NUM_HEADS * T)) // T
    d = np.arange(LANES)
    head_mask = ((h_of_r[:, None] == d[None, :] // D_K)
                 & (d[None, :] < D_MODEL)).astype(np.float32)                         # (KEYS, 128)
    seg_mat = ((r[:, None] // T) == (r[None, :] // T)).astype(np.float32)             # (KEYS, KEYS)
    return jnp.asarray(r_mat), jnp.asarray(head_mask), jnp.asarray(seg_mat)


# ------------------------------------------------------------------
# Parameters + packing (host/JAX glue)
# ------------------------------------------------------------------
def _linear(key, fan_in, fan_out):
    kw, kb = jax.random.split(key)
    w = 0.05 * jax.random.normal(kw, (fan_in, fan_out), jnp.float32)   # stored (in, out): y = x@W + b
    b = 0.01 * jax.random.normal(kb, (fan_out,), jnp.float32)
    return w, b


def init_params(key):
    keys = iter(jax.random.split(key, 2 + NUM_LAYERS * 6 + 1))
    params = {
        "tok_emb": jax.random.normal(next(keys), (VOCAB, D_MODEL // 2), jnp.float32),
        "norm_emb": jax.random.normal(next(keys), (NORM_VOCAB, D_MODEL // 2), jnp.float32),
        "layers": [],
    }
    for _ in range(NUM_LAYERS):
        lp = {}
        lp["wq"], lp["bq"] = _linear(next(keys), D_MODEL, D_MODEL)
        lp["wk"], lp["bk"] = _linear(next(keys), D_MODEL, D_MODEL)
        lp["wv"], lp["bv"] = _linear(next(keys), D_MODEL, D_MODEL)
        lp["wo"], lp["bo"] = _linear(next(keys), D_MODEL, D_MODEL)
        lp["w1"], lp["b1"] = _linear(next(keys), D_MODEL, D_FF)
        lp["w2"], lp["b2"] = _linear(next(keys), D_FF, D_MODEL)
        lp["g1"] = jnp.ones((D_MODEL,), jnp.float32)
        lp["be1"] = jnp.zeros((D_MODEL,), jnp.float32)
        lp["g2"] = jnp.ones((D_MODEL,), jnp.float32)
        lp["be2"] = jnp.zeros((D_MODEL,), jnp.float32)
        params["layers"].append(lp)
    params["w_proj"], params["b_proj"] = _linear(next(keys), D_MODEL, INST_SIZE)
    return params


def pack_params(params):
    """Pack per-layer params into one (L, 784, 128) slab of zero-padded 128x128 blocks."""
    wbuf = np.zeros((NUM_LAYERS, W_ROWS, LANES), np.float32)
    for l, lp in enumerate(params["layers"]):
        wbuf[l, R_WQ:R_WQ + D_MODEL, 0:D_MODEL] = np.asarray(lp["wq"]) * SCALE   # fold 1/sqrt(d_k)
        wbuf[l, R_WK:R_WK + D_MODEL, 0:D_MODEL] = np.asarray(lp["wk"])
        wbuf[l, R_WV:R_WV + D_MODEL, 0:D_MODEL] = np.asarray(lp["wv"])
        wbuf[l, R_WO:R_WO + D_MODEL, 0:D_MODEL] = np.asarray(lp["wo"])
        wbuf[l, R_W1:R_W1 + D_MODEL, 0:D_FF] = np.asarray(lp["w1"])
        wbuf[l, R_W2:R_W2 + D_FF, 0:D_MODEL] = np.asarray(lp["w2"])
        wbuf[l, R_BQ, 0:D_MODEL] = np.asarray(lp["bq"]) * SCALE
        wbuf[l, R_BK, 0:D_MODEL] = np.asarray(lp["bk"])
        wbuf[l, R_BV, 0:D_MODEL] = np.asarray(lp["bv"])
        wbuf[l, R_BO, 0:D_MODEL] = np.asarray(lp["bo"])
        wbuf[l, R_B1, 0:D_FF] = np.asarray(lp["b1"])
        wbuf[l, R_B2, 0:D_MODEL] = np.asarray(lp["b2"])
        wbuf[l, R_G1, 0:D_MODEL] = np.asarray(lp["g1"])
        wbuf[l, R_BE1, 0:D_MODEL] = np.asarray(lp["be1"])
        wbuf[l, R_G2, 0:D_MODEL] = np.asarray(lp["g2"])
        wbuf[l, R_BE2, 0:D_MODEL] = np.asarray(lp["be2"])
    proj = np.zeros((P_ROWS, LANES), np.float32)
    proj[0:D_MODEL, :] = np.asarray(params["w_proj"])
    proj[LANES, :] = np.asarray(params["b_proj"])
    return jnp.asarray(wbuf), jnp.asarray(proj)


def inst_norm_encoder_forward(src, norm_pos, params):
    b_, t_ = src.shape
    # glue: embedding gathers + lane-padded activations (no clean Pallas equivalent for tiny gathers)
    x = jnp.concatenate([params["tok_emb"][src], params["norm_emb"][norm_pos]], axis=-1)
    x_flat = jnp.zeros((b_ * t_, LANES), jnp.float32).at[:, :D_MODEL].set(
        x.reshape(b_ * t_, D_MODEL).astype(jnp.float32))

    # Extended additive mask (B*T, B*H*T): kills padded keys AND cross-batch key columns.
    keep = (src != 0)                                                    # (B, T)
    same_b = jnp.arange(b_)[:, None] == jnp.arange(b_)[None, :]          # (Bq, Bk)
    valid = same_b[:, :, None, None] & keep[None, :, None, :]            # (Bq, Bk, 1, T)
    valid = jnp.broadcast_to(valid, (b_, b_, NUM_HEADS, t_))
    mask_row = jnp.where(valid.reshape(b_, -1), 0.0, -1e9).astype(jnp.float32)   # (Bq, KEYS)
    mask_add = jnp.broadcast_to(mask_row[:, None, :],
                                (b_, t_, mask_row.shape[-1])).reshape(b_ * t_, -1)

    r_mat, head_mask, seg_mat = build_attention_constants()
    wbuf, proj = pack_params(params)
    y = encoder_stack_pallas(x_flat, mask_add, r_mat, head_mask, seg_mat, wbuf, proj)
    return y.reshape(b_, t_, INST_SIZE)


# ------------------------------------------------------------------
# Pure-JAX reference (original PyTorch math) for correctness check
# ------------------------------------------------------------------
def _layer_norm(x, g, b):
    mu = jnp.mean(x, axis=-1, keepdims=True)
    var = jnp.mean(jnp.square(x - mu), axis=-1, keepdims=True)
    return (x - mu) * jax.lax.rsqrt(var + LN_EPS) * g + b


def _mha_ref(xi, keep, lp):
    q = xi @ lp["wq"] + lp["bq"]
    k = xi @ lp["wk"] + lp["bk"]
    v = xi @ lp["wv"] + lp["bv"]
    heads = []
    for h in range(NUM_HEADS):
        s = slice(h * D_K, (h + 1) * D_K)
        sc = (q[:, s] @ k[:, s].T) / math.sqrt(D_K)
        sc = jnp.where(keep[None, :], sc, -1e9)
        heads.append(jax.nn.softmax(sc, axis=-1) @ v[:, s])
    return jnp.concatenate(heads, axis=-1) @ lp["wo"] + lp["bo"]


def _encoder_layer_ref(x, keep, lp):
    def one(xi, ki):
        a = _mha_ref(xi, ki, lp)
        xi = _layer_norm(xi + a, lp["g1"], lp["be1"])
        ff = jnp.maximum(xi @ lp["w1"] + lp["b1"], 0.0) @ lp["w2"] + lp["b2"]
        return _layer_norm(xi + ff, lp["g2"], lp["be2"])
    return jax.vmap(one)(x, keep)


def inst_norm_encoder_forward_ref(src, norm_pos, params):
    x = jnp.concatenate([params["tok_emb"][src], params["norm_emb"][norm_pos]], axis=-1)
    keep = src != 0
    for lp in params["layers"]:
        x = _encoder_layer_ref(x, keep, lp)
    return x @ params["w_proj"] + params["b_proj"]


# ------------------------------------------------------------------
if __name__ == "__main__":
    root = jax.random.PRNGKey(0)
    k_params, k_src, k_np = jax.random.split(root, 3)

    params = init_params(k_params)
    src = jax.random.randint(k_src, (B, T), 1, VOCAB, dtype=jnp.int32)
    src = src.at[0, T - 1].set(0).at[1, 2].set(0)      # padding tokens -> exercises the src mask
    norm_pos = jax.random.randint(k_np, (B, T), 0, NORM_VOCAB, dtype=jnp.int32)

    out = inst_norm_encoder_forward(src, norm_pos, params)
    out = jax.block_until_ready(out)

    ref = inst_norm_encoder_forward_ref(src, norm_pos, params)
    assert out.shape == (B, T, INST_SIZE)
    assert bool(jnp.allclose(out, ref, atol=3e-3, rtol=3e-3)), "mismatch vs pure-JAX reference"

    print("KERNEL_OK")
</pallas_src>

<mosaic_0001>
module attributes {stable_mosaic.version = 11 : i64} {
  func.func @encoder_stack_kernel(%arg0: memref<16x128xf32, #tpu.memory_space<vmem>>, %arg1: memref<16x64xf32, #tpu.memory_space<vmem>>, %arg2: memref<64x16xf32, #tpu.memory_space<vmem>>, %arg3: memref<64x128xf32, #tpu.memory_space<vmem>>, %arg4: memref<64x64xf32, #tpu.memory_space<vmem>>, %arg5: memref<2x784x128xf32, #tpu.memory_space<vmem>>, %arg6: memref<136x128xf32, #tpu.memory_space<vmem>>, %arg7: memref<16x128xf32, #tpu.memory_space<vmem>>) attributes {dimension_semantics = [], scalar_prefetch = 0 : i64, scratch_operands = 0 : i64, tpu.core_type = #tpu.core_type<tc>} {
    %c0 = arith.constant 0 : index
    %c0_0 = arith.constant 0 : index
    %0 = vector.load %arg0[%c0, %c0_0] : memref<16x128xf32, #tpu.memory_space<vmem>>, vector<16x128xf32>
    %c0_1 = arith.constant 0 : index
    %c0_2 = arith.constant 0 : index
    %1 = vector.load %arg1[%c0_1, %c0_2] : memref<16x64xf32, #tpu.memory_space<vmem>>, vector<16x64xf32>
    %c0_3 = arith.constant 0 : index
    %c0_4 = arith.constant 0 : index
    %2 = vector.load %arg2[%c0_3, %c0_4] : memref<64x16xf32, #tpu.memory_space<vmem>>, vector<64x16xf32>
    %c0_5 = arith.constant 0 : index
    %c0_6 = arith.constant 0 : index
    %3 = vector.load %arg3[%c0_5, %c0_6] : memref<64x128xf32, #tpu.memory_space<vmem>>, vector<64x128xf32>
    %c0_7 = arith.constant 0 : index
    %c0_8 = arith.constant 0 : index
    %4 = vector.load %arg4[%c0_7, %c0_8] : memref<64x64xf32, #tpu.memory_space<vmem>>, vector<64x64xf32>
    %c0_9 = arith.constant 0 : index
    %c0_10 = arith.constant 0 : index
    %c0_11 = arith.constant 0 : index
    %5 = vector.load %arg5[%c0_9, %c0_10, %c0_11] : memref<2x784x128xf32, #tpu.memory_space<vmem>>, vector<1x128x128xf32>
    %6 = vector.shape_cast %5 : vector<1x128x128xf32> to vector<128x128xf32>
    %c0_12 = arith.constant 0 : index
    %c128 = arith.constant 128 : index
    %c0_13 = arith.constant 0 : index
    %7 = vector.load %arg5[%c0_12, %c128, %c0_13] : memref<2x784x128xf32, #tpu.memory_space<vmem>>, vector<1x128x128xf32>
    %8 = vector.shape_cast %7 : vector<1x128x128xf32> to vector<128x128xf32>
    %c0_14 = arith.constant 0 : index
    %c256 = arith.constant 256 : index
    %c0_15 = arith.constant 0 : index
    %9 = vector.load %arg5[%c0_14, %c256, %c0_15] : memref<2x784x128xf32, #tpu.memory_space<vmem>>, vector<1x128x128xf32>
    %10 = vector.shape_cast %9 : vector<1x128x128xf32> to vector<128x128xf32>
    %c0_16 = arith.constant 0 : index
    %c384 = arith.constant 384 : index
    %c0_17 = arith.constant 0 : index
    %11 = vector.load %arg5[%c0_16, %c384, %c0_17] : memref<2x784x128xf32, #tpu.memory_space<vmem>>, vector<1x128x128xf32>
    %12 = vector.shape_cast %11 : vector<1x128x128xf32> to vector<128x128xf32>
    %c0_18 = arith.constant 0 : index
    %c512 = arith.constant 512 : index
    %c0_19 = arith.constant 0 : index
    %13 = vector.load %arg5[%c0_18, %c512, %c0_19] : memref<2x784x128xf32, #tpu.memory_space<vmem>>, vector<1x128x128xf32>
    %14 = vector.shape_cast %13 : vector<1x128x128xf32> to vector<128x128xf32>
    %c0_20 = arith.constant 0 : index
    %c640 = arith.constant 640 : index
    %c0_21 = arith.constant 0 : index
    %15 = vector.load %arg5[%c0_20, %c640, %c0_21] : memref<2x784x128xf32, #tpu.memory_space<vmem>>, vector<1x128x128xf32>
    %16 = vector.shape_cast %15 : vector<1x128x128xf32> to vector<128x128xf32>
    %c0_22 = arith.constant 0 : index
    %c768 = arith.constant 768 : index
    %c0_23 = arith.constant 0 : index
    %17 = vector.load %arg5[%c0_22, %c768, %c0_23] : memref<2x784x128xf32, #tpu.memory_space<vmem>>, vector<1x1x128xf32>
    %18 = vector.shape_cast %17 : vector<1x1x128xf32> to vector<1x128xf32>
    %c0_24 = arith.constant 0 : index
    %c769 = arith.constant 769 : index
    %c0_25 = arith.constant 0 : index
    %19 = vector.load %arg5[%c0_24, %c769, %c0_25] : memref<2x784x128xf32, #tpu.memory_space<vmem>>, vector<1x1x128xf32>
    %20 = vector.shape_cast %19 : vector<1x1x128xf32> to vector<1x128xf32>
    %c0_26 = arith.constant 0 : index
    %c770 = arith.constant 770 : index
    %c0_27 = arith.constant 0 : index
    %21 = vector.load %arg5[%c0_26, %c770, %c0_27] : memref<2x784x128xf32, #tpu.memory_space<vmem>>, vector<1x1x128xf32>
    %22 = vector.shape_cast %21 : vector<1x1x128xf32> to vector<1x128xf32>
    %c0_28 = arith.constant 0 : index
    %c771 = arith.constant 771 : index
    %c0_29 = arith.constant 0 : index
    %23 = vector.load %arg5[%c0_28, %c771, %c0_29] : memref<2x784x128xf32, #tpu.memory_space<vmem>>, vector<1x1x128xf32>
    %24 = vector.shape_cast %23 : vector<1x1x128xf32> to vector<1x128xf32>
    %c0_30 = arith.constant 0 : index
    %c772 = arith.constant 772 : index
    %c0_31 = arith.constant 0 : index
    %25 = vector.load %arg5[%c0_30, %c772, %c0_31] : memref<2x784x128xf32, #tpu.memory_space<vmem>>, vector<1x1x128xf32>
    %26 = vector.shape_cast %25 : vector<1x1x128xf32> to vector<1x128xf32>
    %c0_32 = arith.constant 0 : index
    %c773 = arith.constant 773 : index
    %c0_33 = arith.constant 0 : index
    %27 = vector.load %arg5[%c0_32, %c773, %c0_33] : memref<2x784x128xf32, #tpu.memory_space<vmem>>, vector<1x1x128xf32>
    %28 = vector.shape_cast %27 : vector<1x1x128xf32> to vector<1x128xf32>
    %c0_34 = arith.constant 0 : index
    %c774 = arith.constant 774 : index
    %c0_35 = arith.constant 0 : index
    %29 = vector.load %arg5[%c0_34, %c774, %c0_35] : memref<2x784x128xf32, #tpu.memory_space<vmem>>, vector<1x1x128xf32>
    %30 = vector.shape_cast %29 : vector<1x1x128xf32> to vector<1x128xf32>
    %c0_36 = arith.constant 0 : index
    %c775 = arith.constant 775 : index
    %c0_37 = arith.constant 0 : index
    %31 = vector.load %arg5[%c0_36, %c775, %c0_37] : memref<2x784x128xf32, #tpu.memory_space<vmem>>, vector<1x1x128xf32>
    %32 = vector.shape_cast %31 : vector<1x1x128xf32> to vector<1x128xf32>
    %c0_38 = arith.constant 0 : index
    %c776 = arith.constant 776 : index
    %c0_39 = arith.constant 0 : index
    %33 = vector.load %arg5[%c0_38, %c776, %c0_39] : memref<2x784x128xf32, #tpu.memory_space<vmem>>, vector<1x1x128xf32>
    %34 = vector.shape_cast %33 : vector<1x1x128xf32> to vector<1x128xf32>
    %c0_40 = arith.constant 0 : index
    %c777 = arith.constant 777 : index
    %c0_41 = arith.constant 0 : index
    %35 = vector.load %arg5[%c0_40, %c777, %c0_41] : memref<2x784x128xf32, #tpu.memory_space<vmem>>, vector<1x1x128xf32>
    %36 = vector.shape_cast %35 : vector<1x1x128xf32> to vector<1x128xf32>
    %cst = arith.constant dense<0.000000e+00> : vector<16x128xf32>
    %37 = tpu.matmul %0, %6, %cst {dimension_numbers = #tpu.dot_dimension_numbers<[1], [0], [0], [1], [0, 0, 1, 1], [], []>} : vector<16x128xf32>, vector<128x128xf32>, vector<16x128xf32> -> vector<16x128xf32>
    %38 = vector.broadcast %18 : vector<1x128xf32> to vector<16x128xf32>
    %39 = arith.addf %37, %38 : vector<16x128xf32>
    %cst_42 = arith.constant dense<0.000000e+00> : vector<16x128xf32>
    %40 = tpu.matmul %0, %8, %cst_42 {dimension_numbers = #tpu.dot_dimension_numbers<[1], [0], [0], [1], [0, 0, 1, 1], [], []>} : vector<16x128xf32>, vector<128x128xf32>, vector<16x128xf32> -> vector<16x128xf32>
    %41 = vector.broadcast %20 : vector<1x128xf32> to vector<16x128xf32>
    %42 = arith.addf %40, %41 : vector<16x128xf32>
    %cst_43 = arith.constant dense<0.000000e+00> : vector<16x128xf32>
    %43 = tpu.matmul %0, %10, %cst_43 {dimension_numbers = #tpu.dot_dimension_numbers<[1], [0], [0], [1], [0, 0, 1, 1], [], []>} : vector<16x128xf32>, vector<128x128xf32>, vector<16x128xf32> -> vector<16x128xf32>
    %44 = vector.broadcast %22 : vector<1x128xf32> to vector<16x128xf32>
    %45 = arith.addf %43, %44 : vector<16x128xf32>
    %cst_44 = arith.constant dense<0.000000e+00> : vector<64x128xf32>
    %46 = tpu.matmul %2, %42, %cst_44 {dimension_numbers = #tpu.dot_dimension_numbers<[1], [0], [0], [1], [0, 0, 1, 1], [], []>} : vector<64x16xf32>, vector<16x128xf32>, vector<64x128xf32> -> vector<64x128xf32>
    %47 = arith.mulf %46, %3 : vector<64x128xf32>
    %cst_45 = arith.constant dense<0.000000e+00> : vector<64x128xf32>
    %48 = tpu.matmul %2, %45, %cst_45 {dimension_numbers = #tpu.dot_dimension_numbers<[1], [0], [0], [1], [0, 0, 1, 1], [], []>} : vector<64x16xf32>, vector<16x128xf32>, vector<64x128xf32> -> vector<64x128xf32>
    %49 = arith.mulf %48, %3 : vector<64x128xf32>
    %cst_46 = arith.constant dense<0.000000e+00> : vector<16x64xf32>
    %50 = tpu.matmul %39, %47, %cst_46 {dimension_numbers = #tpu.dot_dimension_numbers<[1], [1], [0], [0], [0, 0, 1, 0], [], []>} : vector<16x128xf32>, vector<64x128xf32>, vector<16x64xf32> -> vector<16x64xf32>
    %51 = arith.addf %50, %1 : vector<16x64xf32>
    %cst_47 = arith.constant dense<0xFF800000> : vector<16xf32>
    %52 = vector.multi_reduction <maximumf>, %51, %cst_47 [1] : vector<16x64xf32> to vector<16xf32>
    %53 = vector.shape_cast %52 : vector<16xf32> to vector<16x1xf32>
    %54 = vector.broadcast %53 : vector<16x1xf32> to vector<16x64xf32>
    %55 = arith.subf %51, %54 : vector<16x64xf32>
    %56 = math.exp %55 : vector<16x64xf32>
    %cst_48 = arith.constant dense<0.000000e+00> : vector<16x64xf32>
    %57 = tpu.matmul %56, %4, %cst_48 {dimension_numbers = #tpu.dot_dimension_numbers<[1], [0], [0], [1], [0, 0, 1, 1], [], []>} : vector<16x64xf32>, vector<64x64xf32>, vector<16x64xf32> -> vector<16x64xf32>
    %cst_49 = arith.constant 9.99999971E-10 : f32
    %58 = vector.broadcast %cst_49 : f32 to vector<16x64xf32>
    %59 = arith.addf %57, %58 : vector<16x64xf32>
    %60 = tpu.reciprocal %59 {approx = true} : vector<16x64xf32> -> vector<16x64xf32>
    %61 = arith.mulf %56, %60 : vector<16x64xf32>
    %cst_50 = arith.constant dense<0.000000e+00> : vector<16x128xf32>
    %62 = tpu.matmul %61, %49, %cst_50 {dimension_numbers = #tpu.dot_dimension_numbers<[1], [0], [0], [1], [0, 0, 1, 1], [], []>} : vector<16x64xf32>, vector<64x128xf32>, vector<16x128xf32> -> vector<16x128xf32>
    %cst_51 = arith.constant dense<0.000000e+00> : vector<16x128xf32>
    %63 = tpu.matmul %62, %12, %cst_51 {dimension_numbers = #tpu.dot_dimension_numbers<[1], [0], [0], [1], [0, 0, 1, 1], [], []>} : vector<16x128xf32>, vector<128x128xf32>, vector<16x128xf32> -> vector<16x128xf32>
    %64 = vector.broadcast %24 : vector<1x128xf32> to vector<16x128xf32>
    %65 = arith.addf %63, %64 : vector<16x128xf32>
    %66 = arith.addf %0, %65 : vector<16x128xf32>
    %cst_52 = arith.constant dense<0.000000e+00> : vector<16xf32>
    %67 = vector.multi_reduction <add>, %66, %cst_52 [1] : vector<16x128xf32> to vector<16xf32>
    %68 = vector.shape_cast %67 : vector<16xf32> to vector<16x1xf32>
    %cst_53 = arith.constant 3.125000e-02 : f32
    %69 = vector.broadcast %cst_53 : f32 to vector<16x1xf32>
    %70 = arith.mulf %68, %69 : vector<16x1xf32>
    %71 = arith.mulf %66, %66 : vector<16x128xf32>
    %cst_54 = arith.constant dense<0.000000e+00> : vector<16xf32>
    %72 = vector.multi_reduction <add>, %71, %cst_54 [1] : vector<16x128xf32> to vector<16xf32>
    %73 = vector.shape_cast %72 : vector<16xf32> to vector<16x1xf32>
    %cst_55 = arith.constant 3.125000e-02 : f32
    %74 = vector.broadcast %cst_55 : f32 to vector<16x1xf32>
    %75 = arith.mulf %73, %74 : vector<16x1xf32>
    %76 = arith.mulf %70, %70 : vector<16x1xf32>
    %77 = arith.subf %75, %76 : vector<16x1xf32>
    %78 = vector.broadcast %70 : vector<16x1xf32> to vector<16x128xf32>
    %79 = arith.subf %66, %78 : vector<16x128xf32>
    %cst_56 = arith.constant 9.99999974E-6 : f32
    %80 = vector.broadcast %cst_56 : f32 to vector<16x1xf32>
    %81 = arith.addf %77, %80 : vector<16x1xf32>
    %82 = math.rsqrt %81 : vector<16x1xf32>
    %83 = vector.broadcast %82 : vector<16x1xf32> to vector<16x128xf32>
    %84 = arith.mulf %79, %83 : vector<16x128xf32>
    %85 = vector.broadcast %30 : vector<1x128xf32> to vector<16x128xf32>
    %86 = arith.mulf %84, %85 : vector<16x128xf32>
    %87 = vector.broadcast %32 : vector<1x128xf32> to vector<16x128xf32>
    %88 = arith.addf %86, %87 : vector<16x128xf32>
    %cst_57 = arith.constant dense<0.000000e+00> : vector<16x128xf32>
    %89 = tpu.matmul %88, %14, %cst_57 {dimension_numbers = #tpu.dot_dimension_numbers<[1], [0], [0], [1], [0, 0, 1, 1], [], []>} : vector<16x128xf32>, vector<128x128xf32>, vector<16x128xf32> -> vector<16x128xf32>
    %90 = vector.broadcast %26 : vector<1x128xf32> to vector<16x128xf32>
    %91 = arith.addf %89, %90 : vector<16x128xf32>
    %cst_58 = arith.constant 0.000000e+00 : f32
    %92 = vector.broadcast %cst_58 : f32 to vector<16x128xf32>
    %93 = arith.maximumf %91, %92 : vector<16x128xf32>
    %cst_59 = arith.constant dense<0.000000e+00> : vector<16x128xf32>
    %94 = tpu.matmul %93, %16, %cst_59 {dimension_numbers = #tpu.dot_dimension_numbers<[1], [0], [0], [1], [0, 0, 1, 1], [], []>} : vector<16x128xf32>, vector<128x128xf32>, vector<16x128xf32> -> vector<16x128xf32>
    %95 = vector.broadcast %28 : vector<1x128xf32> to vector<16x128xf32>
    %96 = arith.addf %94, %95 : vector<16x128xf32>
    %97 = arith.addf %88, %96 : vector<16x128xf32>
    %cst_60 = arith.constant dense<0.000000e+00> : vector<16xf32>
    %98 = vector.multi_reduction <add>, %97, %cst_60 [1] : vector<16x128xf32> to vector<16xf32>
    %99 = vector.shape_cast %98 : vector<16xf32> to vector<16x1xf32>
    %cst_61 = arith.constant 3.125000e-02 : f32
    %100 = vector.broadcast %cst_61 : f32 to vector<16x1xf32>
    %101 = arith.mulf %99, %100 : vector<16x1xf32>
    %102 = arith.mulf %97, %97 : vector<16x128xf32>
    %cst_62 = arith.constant dense<0.000000e+00> : vector<16xf32>
    %103 = vector.multi_reduction <add>, %102, %cst_62 [1] : vector<16x128xf32> to vector<16xf32>
    %104 = vector.shape_cast %103 : vector<16xf32> to vector<16x1xf32>
    %cst_63 = arith.constant 3.125000e-02 : f32
    %105 = vector.broadcast %cst_63 : f32 to vector<16x1xf32>
    %106 = arith.mulf %104, %105 : vector<16x1xf32>
    %107 = arith.mulf %101, %101 : vector<16x1xf32>
    %108 = arith.subf %106, %107 : vector<16x1xf32>
    %109 = vector.broadcast %101 : vector<16x1xf32> to vector<16x128xf32>
    %110 = arith.subf %97, %109 : vector<16x128xf32>
    %cst_64 = arith.constant 9.99999974E-6 : f32
    %111 = vector.broadcast %cst_64 : f32 to vector<16x1xf32>
    %112 = arith.addf %108, %111 : vector<16x1xf32>
    %113 = math.rsqrt %112 : vector<16x1xf32>
    %114 = vector.broadcast %113 : vector<16x1xf32> to vector<16x128xf32>
    %115 = arith.mulf %110, %114 : vector<16x128xf32>
    %116 = vector.broadcast %34 : vector<1x128xf32> to vector<16x128xf32>
    %117 = arith.mulf %115, %116 : vector<16x128xf32>
    %118 = vector.broadcast %36 : vector<1x128xf32> to vector<16x128xf32>
    %119 = arith.addf %117, %118 : vector<16x128xf32>
    %c1 = arith.constant 1 : index
    %c0_65 = arith.constant 0 : index
    %c0_66 = arith.constant 0 : index
    %120 = vector.load %arg5[%c1, %c0_65, %c0_66] : memref<2x784x128xf32, #tpu.memory_space<vmem>>, vector<1x128x128xf32>
    %121 = vector.shape_cast %120 : vector<1x128x128xf32> to vector<128x128xf32>
    %c1_67 = arith.constant 1 : index
    %c128_68 = arith.constant 128 : index
    %c0_69 = arith.constant 0 : index
    %122 = vector.load %arg5[%c1_67, %c128_68, %c0_69] : memref<2x784x128xf32, #tpu.memory_space<vmem>>, vector<1x128x128xf32>
    %123 = vector.shape_cast %122 : vector<1x128x128xf32> to vector<128x128xf32>
    %c1_70 = arith.constant 1 : index
    %c256_71 = arith.constant 256 : index
    %c0_72 = arith.constant 0 : index
    %124 = vector.load %arg5[%c1_70, %c256_71, %c0_72] : memref<2x784x128xf32, #tpu.memory_space<vmem>>, vector<1x128x128xf32>
    %125 = vector.shape_cast %124 : vector<1x128x128xf32> to vector<128x128xf32>
    %c1_73 = arith.constant 1 : index
    %c384_74 = arith.constant 384 : index
    %c0_75 = arith.constant 0 : index
    %126 = vector.load %arg5[%c1_73, %c384_74, %c0_75] : memref<2x784x128xf32, #tpu.memory_space<vmem>>, vector<1x128x128xf32>
    %127 = vector.shape_cast %126 : vector<1x128x128xf32> to vector<128x128xf32>
    %c1_76 = arith.constant 1 : index
    %c512_77 = arith.constant 512 : index
    %c0_78 = arith.constant 0 : index
    %128 = vector.load %arg5[%c1_76, %c512_77, %c0_78] : memref<2x784x128xf32, #tpu.memory_space<vmem>>, vector<1x128x128xf32>
    %129 = vector.shape_cast %128 : vector<1x128x128xf32> to vector<128x128xf32>
    %c1_79 = arith.constant 1 : index
    %c640_80 = arith.constant 640 : index
    %c0_81 = arith.constant 0 : index
    %130 = vector.load %arg5[%c1_79, %c640_80, %c0_81] : memref<2x784x128xf32, #tpu.memory_space<vmem>>, vector<1x128x128xf32>
    %131 = vector.shape_cast %130 : vector<1x128x128xf32> to vector<128x128xf32>
    %c1_82 = arith.constant 1 : index
    %c768_83 = arith.constant 768 : index
    %c0_84 = arith.constant 0 : index
    %132 = vector.load %arg5[%c1_82, %c768_83, %c0_84] : memref<2x784x128xf32, #tpu.memory_space<vmem>>, vector<1x1x128xf32>
    %133 = vector.shape_cast %132 : vector<1x1x128xf32> to vector<1x128xf32>
    %c1_85 = arith.constant 1 : index
    %c769_86 = arith.constant 769 : index
    %c0_87 = arith.constant 0 : index
    %134 = vector.load %arg5[%c1_85, %c769_86, %c0_87] : memref<2x784x128xf32, #tpu.memory_space<vmem>>, vector<1x1x128xf32>
    %135 = vector.shape_cast %134 : vector<1x1x128xf32> to vector<1x128xf32>
    %c1_88 = arith.constant 1 : index
    %c770_89 = arith.constant 770 : index
    %c0_90 = arith.constant 0 : index
    %136 = vector.load %arg5[%c1_88, %c770_89, %c0_90] : memref<2x784x128xf32, #tpu.memory_space<vmem>>, vector<1x1x128xf32>
    %137 = vector.shape_cast %136 : vector<1x1x128xf32> to vector<1x128xf32>
    %c1_91 = arith.constant 1 : index
    %c771_92 = arith.constant 771 : index
    %c0_93 = arith.constant 0 : index
    %138 = vector.load %arg5[%c1_91, %c771_92, %c0_93] : memref<2x784x128xf32, #tpu.memory_space<vmem>>, vector<1x1x128xf32>
    %139 = vector.shape_cast %138 : vector<1x1x128xf32> to vector<1x128xf32>
    %c1_94 = arith.constant 1 : index
    %c772_95 = arith.constant 772 : index
    %c0_96 = arith.constant 0 : index
    %140 = vector.load %arg5[%c1_94, %c772_95, %c0_96] : memref<2x784x128xf32, #tpu.memory_space<vmem>>, vector<1x1x128xf32>
    %141 = vector.shape_cast %140 : vector<1x1x128xf32> to vector<1x128xf32>
    %c1_97 = arith.constant 1 : index
    %c773_98 = arith.constant 773 : index
    %c0_99 = arith.constant 0 : index
    %142 = vector.load %arg5[%c1_97, %c773_98, %c0_99] : memref<2x784x128xf32, #tpu.memory_space<vmem>>, vector<1x1x128xf32>
    %143 = vector.shape_cast %142 : vector<1x1x128xf32> to vector<1x128xf32>
    %c1_100 = arith.constant 1 : index
    %c774_101 = arith.constant 774 : index
    %c0_102 = arith.constant 0 : index
    %144 = vector.load %arg5[%c1_100, %c774_101, %c0_102] : memref<2x784x128xf32, #tpu.memory_space<vmem>>, vector<1x1x128xf32>
    %145 = vector.shape_cast %144 : vector<1x1x128xf32> to vector<1x128xf32>
    %c1_103 = arith.constant 1 : index
    %c775_104 = arith.constant 775 : index
    %c0_105 = arith.constant 0 : index
    %146 = vector.load %arg5[%c1_103, %c775_104, %c0_105] : memref<2x784x128xf32, #tpu.memory_space<vmem>>, vector<1x1x128xf32>
    %147 = vector.shape_cast %146 : vector<1x1x128xf32> to vector<1x128xf32>
    %c1_106 = arith.constant 1 : index
    %c776_107 = arith.constant 776 : index
    %c0_108 = arith.constant 0 : index
    %148 = vector.load %arg5[%c1_106, %c776_107, %c0_108] : memref<2x784x128xf32, #tpu.memory_space<vmem>>, vector<1x1x128xf32>
    %149 = vector.shape_cast %148 : vector<1x1x128xf32> to vector<1x128xf32>
    %c1_109 = arith.constant 1 : index
    %c777_110 = arith.constant 777 : index
    %c0_111 = arith.constant 0 : index
    %150 = vector.load %arg5[%c1_109, %c777_110, %c0_111] : memref<2x784x128xf32, #tpu.memory_space<vmem>>, vector<1x1x128xf32>
    %151 = vector.shape_cast %150 : vector<1x1x128xf32> to vector<1x128xf32>
    %cst_112 = arith.constant dense<0.000000e+00> : vector<16x128xf32>
    %152 = tpu.matmul %119, %121, %cst_112 {dimension_numbers = #tpu.dot_dimension_numbers<[1], [0], [0], [1], [0, 0, 1, 1], [], []>} : vector<16x128xf32>, vector<128x128xf32>, vector<16x128xf32> -> vector<16x128xf32>
    %153 = vector.broadcast %133 : vector<1x128xf32> to vector<16x128xf32>
    %154 = arith.addf %152, %153 : vector<16x128xf32>
    %cst_113 = arith.constant dense<0.000000e+00> : vector<16x128xf32>
    %155 = tpu.matmul %119, %123, %cst_113 {dimension_numbers = #tpu.dot_dimension_numbers<[1], [0], [0], [1], [0, 0, 1, 1], [], []>} : vector<16x128xf32>, vector<128x128xf32>, vector<16x128xf32> -> vector<16x128xf32>
    %156 = vector.broadcast %135 : vector<1x128xf32> to vector<16x128xf32>
    %157 = arith.addf %155, %156 : vector<16x128xf32>
    %cst_114 = arith.constant dense<0.000000e+00> : vector<16x128xf32>
    %158 = tpu.matmul %119, %125, %cst_114 {dimension_numbers = #tpu.dot_dimension_numbers<[1], [0], [0], [1], [0, 0, 1, 1], [], []>} : vector<16x128xf32>, vector<128x128xf32>, vector<16x128xf32> -> vector<16x128xf32>
    %159 = vector.broadcast %137 : vector<1x128xf32> to vector<16x128xf32>
    %160 = arith.addf %158, %159 : vector<16x128xf32>
    %cst_115 = arith.constant dense<0.000000e+00> : vector<64x128xf32>
    %161 = tpu.matmul %2, %157, %cst_115 {dimension_numbers = #tpu.dot_dimension_numbers<[1], [0], [0], [1], [0, 0, 1, 1], [], []>} : vector<64x16xf32>, vector<16x128xf32>, vector<64x128xf32> -> vector<64x128xf32>
    %162 = arith.mulf %161, %3 : vector<64x128xf32>
    %cst_116 = arith.constant dense<0.000000e+00> : vector<64x128xf32>
    %163 = tpu.matmul %2, %160, %cst_116 {dimension_numbers = #tpu.dot_dimension_numbers<[1], [0], [0], [1], [0, 0, 1, 1], [], []>} : vector<64x16xf32>, vector<16x128xf32>, vector<64x128xf32> -> vector<64x128xf32>
    %164 = arith.mulf %163, %3 : vector<64x128xf32>
    %cst_117 = arith.constant dense<0.000000e+00> : vector<16x64xf32>
    %165 = tpu.matmul %154, %162, %cst_117 {dimension_numbers = #tpu.dot_dimension_numbers<[1], [1], [0], [0], [0, 0, 1, 0], [], []>} : vector<16x128xf32>, vector<64x128xf32>, vector<16x64xf32> -> vector<16x64xf32>
    %166 = arith.addf %165, %1 : vector<16x64xf32>
    %cst_118 = arith.constant dense<0xFF800000> : vector<16xf32>
    %167 = vector.multi_reduction <maximumf>, %166, %cst_118 [1] : vector<16x64xf32> to vector<16xf32>
    %168 = vector.shape_cast %167 : vector<16xf32> to vector<16x1xf32>
    %169 = vector.broadcast %168 : vector<16x1xf32> to vector<16x64xf32>
    %170 = arith.subf %166, %169 : vector<16x64xf32>
    %171 = math.exp %170 : vector<16x64xf32>
    %cst_119 = arith.constant dense<0.000000e+00> : vector<16x64xf32>
    %172 = tpu.matmul %171, %4, %cst_119 {dimension_numbers = #tpu.dot_dimension_numbers<[1], [0], [0], [1], [0, 0, 1, 1], [], []>} : vector<16x64xf32>, vector<64x64xf32>, vector<16x64xf32> -> vector<16x64xf32>
    %cst_120 = arith.constant 9.99999971E-10 : f32
    %173 = vector.broadcast %cst_120 : f32 to vector<16x64xf32>
    %174 = arith.addf %172, %173 : vector<16x64xf32>
    %175 = tpu.reciprocal %174 {approx = true} : vector<16x64xf32> -> vector<16x64xf32>
    %176 = arith.mulf %171, %175 : vector<16x64xf32>
    %cst_121 = arith.constant dense<0.000000e+00> : vector<16x128xf32>
    %177 = tpu.matmul %176, %164, %cst_121 {dimension_numbers = #tpu.dot_dimension_numbers<[1], [0], [0], [1], [0, 0, 1, 1], [], []>} : vector<16x64xf32>, vector<64x128xf32>, vector<16x128xf32> -> vector<16x128xf32>
    %cst_122 = arith.constant dense<0.000000e+00> : vector<16x128xf32>
    %178 = tpu.matmul %177, %127, %cst_122 {dimension_numbers = #tpu.dot_dimension_numbers<[1], [0], [0], [1], [0, 0, 1, 1], [], []>} : vector<16x128xf32>, vector<128x128xf32>, vector<16x128xf32> -> vector<16x128xf32>
    %179 = vector.broadcast %139 : vector<1x128xf32> to vector<16x128xf32>
    %180 = arith.addf %178, %179 : vector<16x128xf32>
    %181 = arith.addf %119, %180 : vector<16x128xf32>
    %cst_123 = arith.constant dense<0.000000e+00> : vector<16xf32>
    %182 = vector.multi_reduction <add>, %181, %cst_123 [1] : vector<16x128xf32> to vector<16xf32>
    %183 = vector.shape_cast %182 : vector<16xf32> to vector<16x1xf32>
    %cst_124 = arith.constant 3.125000e-02 : f32
    %184 = vector.broadcast %cst_124 : f32 to vector<16x1xf32>
    %185 = arith.mulf %183, %184 : vector<16x1xf32>
    %186 = arith.mulf %181, %181 : vector<16x128xf32>
    %cst_125 = arith.constant dense<0.000000e+00> : vector<16xf32>
    %187 = vector.multi_reduction <add>, %186, %cst_125 [1] : vector<16x128xf32> to vector<16xf32>
    %188 = vector.shape_cast %187 : vector<16xf32> to vector<16x1xf32>
    %cst_126 = arith.constant 3.125000e-02 : f32
    %189 = vector.broadcast %cst_126 : f32 to vector<16x1xf32>
    %190 = arith.mulf %188, %189 : vector<16x1xf32>
    %191 = arith.mulf %185, %185 : vector<16x1xf32>
    %192 = arith.subf %190, %191 : vector<16x1xf32>
    %193 = vector.broadcast %185 : vector<16x1xf32> to vector<16x128xf32>
    %194 = arith.subf %181, %193 : vector<16x128xf32>
    %cst_127 = arith.constant 9.99999974E-6 : f32
    %195 = vector.broadcast %cst_127 : f32 to vector<16x1xf32>
    %196 = arith.addf %192, %195 : vector<16x1xf32>
    %197 = math.rsqrt %196 : vector<16x1xf32>
    %198 = vector.broadcast %197 : vector<16x1xf32> to vector<16x128xf32>
    %199 = arith.mulf %194, %198 : vector<16x128xf32>
    %200 = vector.broadcast %145 : vector<1x128xf32> to vector<16x128xf32>
    %201 = arith.mulf %199, %200 : vector<16x128xf32>
    %202 = vector.broadcast %147 : vector<1x128xf32> to vector<16x128xf32>
    %203 = arith.addf %201, %202 : vector<16x128xf32>
    %cst_128 = arith.constant dense<0.000000e+00> : vector<16x128xf32>
    %204 = tpu.matmul %203, %129, %cst_128 {dimension_numbers = #tpu.dot_dimension_numbers<[1], [0], [0], [1], [0, 0, 1, 1], [], []>} : vector<16x128xf32>, vector<128x128xf32>, vector<16x128xf32> -> vector<16x128xf32>
    %205 = vector.broadcast %141 : vector<1x128xf32> to vector<16x128xf32>
    %206 = arith.addf %204, %205 : vector<16x128xf32>
    %cst_129 = arith.constant 0.000000e+00 : f32
    %207 = vector.broadcast %cst_129 : f32 to vector<16x128xf32>
    %208 = arith.maximumf %206, %207 : vector<16x128xf32>
    %cst_130 = arith.constant dense<0.000000e+00> : vector<16x128xf32>
    %209 = tpu.matmul %208, %131, %cst_130 {dimension_numbers = #tpu.dot_dimension_numbers<[1], [0], [0], [1], [0, 0, 1, 1], [], []>} : vector<16x128xf32>, vector<128x128xf32>, vector<16x128xf32> -> vector<16x128xf32>
    %210 = vector.broadcast %143 : vector<1x128xf32> to vector<16x128xf32>
    %211 = arith.addf %209, %210 : vector<16x128xf32>
    %212 = arith.addf %203, %211 : vector<16x128xf32>
    %cst_131 = arith.constant dense<0.000000e+00> : vector<16xf32>
    %213 = vector.multi_reduction <add>, %212, %cst_131 [1] : vector<16x128xf32> to vector<16xf32>
    %214 = vector.shape_cast %213 : vector<16xf32> to vector<16x1xf32>
    %cst_132 = arith.constant 3.125000e-02 : f32
    %215 = vector.broadcast %cst_132 : f32 to vector<16x1xf32>
    %216 = arith.mulf %214, %215 : vector<16x1xf32>
    %217 = arith.mulf %212, %212 : vector<16x128xf32>
    %cst_133 = arith.constant dense<0.000000e+00> : vector<16xf32>
    %218 = vector.multi_reduction <add>, %217, %cst_133 [1] : vector<16x128xf32> to vector<16xf32>
    %219 = vector.shape_cast %218 : vector<16xf32> to vector<16x1xf32>
    %cst_134 = arith.constant 3.125000e-02 : f32
    %220 = vector.broadcast %cst_134 : f32 to vector<16x1xf32>
    %221 = arith.mulf %219, %220 : vector<16x1xf32>
    %222 = arith.mulf %216, %216 : vector<16x1xf32>
    %223 = arith.subf %221, %222 : vector<16x1xf32>
    %224 = vector.broadcast %216 : vector<16x1xf32> to vector<16x128xf32>
    %225 = arith.subf %212, %224 : vector<16x128xf32>
    %cst_135 = arith.constant 9.99999974E-6 : f32
    %226 = vector.broadcast %cst_135 : f32 to vector<16x1xf32>
    %227 = arith.addf %223, %226 : vector<16x1xf32>
    %228 = math.rsqrt %227 : vector<16x1xf32>
    %229 = vector.broadcast %228 : vector<16x1xf32> to vector<16x128xf32>
    %230 = arith.mulf %225, %229 : vector<16x128xf32>
    %231 = vector.broadcast %149 : vector<1x128xf32> to vector<16x128xf32>
    %232 = arith.mulf %230, %231 : vector<16x128xf32>
    %233 = vector.broadcast %151 : vector<1x128xf32> to vector<16x128xf32>
    %234 = arith.addf %232, %233 : vector<16x128xf32>
    %c0_136 = arith.constant 0 : index
    %c0_137 = arith.constant 0 : index
    %235 = vector.load %arg6[%c0_136, %c0_137] : memref<136x128xf32, #tpu.memory_space<vmem>>, vector<128x128xf32>
    %c128_138 = arith.constant 128 : index
    %c0_139 = arith.constant 0 : index
    %236 = vector.load %arg6[%c128_138, %c0_139] : memref<136x128xf32, #tpu.memory_space<vmem>>, vector<1x128xf32>
    %cst_140 = arith.constant dense<0.000000e+00> : vector<16x128xf32>
    %237 = tpu.matmul %234, %235, %cst_140 {dimension_numbers = #tpu.dot_dimension_numbers<[1], [0], [0], [1], [0, 0, 1, 1], [], []>} : vector<16x128xf32>, vector<128x128xf32>, vector<16x128xf32> -> vector<16x128xf32>
    %238 = vector.broadcast %236 : vector<1x128xf32> to vector<16x128xf32>
    %239 = arith.addf %237, %238 : vector<16x128xf32>
    %c0_141 = arith.constant 0 : index
    %c0_142 = arith.constant 0 : index
    %240 = vector.load %arg7[%c0_141, %c0_142] : memref<16x128xf32, #tpu.memory_space<vmem>>, vector<16x128xf32>
    tpu.vector_store %arg7[%c0_141, %c0_142], %239 {strides = array<i32>} : memref<16x128xf32, #tpu.memory_space<vmem>>, vector<16x128xf32>,
    return
  }
}

</mosaic_0001>

<bundles_post_ra>
// kernel: tpu_custom_call.1
= control target key start
LH: loop header
LB: loop body
LE: loop exit
PB: predicated region body
PF: predicated region fallthrough
CT: control target
= control target key end

     0   :  { %12 = vsyncpa [#allocation3], 0  ;;  %s4062_s0 = inlined_call_operand.vmem [shape: f32[16,128], index: 0, kind: input, shape index: {}]   ;;  %s4063_s1 = inlined_call_operand.hbm [shape: f32[16,64], index: 1, kind: input, shape index: {}]   ;;  %s4064_s2 = inlined_call_operand.vmem [shape: f32[64,16], index: 2, kind: input, shape index: {}]   ;;  %s4065_s3 = inlined_call_operand.vmem [shape: f32[64,128], index: 3, kind: input, shape index: {}]   ;;  %s4066_s4 = inlined_call_operand.hbm [shape: f32[64,64], index: 4, kind: input, shape index: {}]   ;;  %s4067_s5 = inlined_call_operand.hbm [shape: f32[2,784,128], index: 5, kind: input, shape index: {}]   ;;  %s4068_s6 = inlined_call_operand.hbm [shape: f32[136,128], index: 6, kind: input, shape index: {}]   ;;  %s4069_s7 = inlined_call_operand.hbm [shape: f32[16,128], index: 7, kind: output, shape index: {}]  }
   0x1   :  { %13 = vsyncpa [#allocation6], 0 }
   0x2   :  { %14 = vsyncpa [#allocation9], 0 }
   0x3   :  { %15 = vsyncpa [#allocation4], 0  ;;  %s3737_s24 = smov [#allocation5]   ;;  %s3738_s26 = smov [#allocation2]  }
   0x4   :  { %s39_s25 = sshll.u32 %s3737_s24, 4  ;;  %s23_s27 = sshll.u32 %s3738_s26, 4  ;;  %s40_s25 = int_to_ptr.vmem [resolvable:$true] %s39_s25  ;;  %s24_s27 = int_to_ptr.vmem [resolvable:$true] %s23_s27 }
   0x5   :  { %s3637_s28 = scalar_lea.vmem %s40_s25, 1024  ;;  %p3642_p1 = scmp.lt.s32.totalorder %s40_s25, %s40_s25 }
   0x6   :  { %p3638_p0 = scmp.ne.s32.totalorder %s40_s25, %s3637_s28  ;;  %p3643_p2 = scmp.lt.s32.totalorder %s3637_s28, %s3637_s28 }
   0x8   :  { %p3644_p3 = por %p3643_p2, %p3642_p1 }
   0xa   :  { %p3645_p4 = pnand %p3644_p3, %p3638_p0 }
   0xc   :  { %3648 = shalt.err (!%p3645_p4)
}
   0xd   :  { %s3739_s29 = smov 128   ;;  %s3740_s30 = smov 8  }
   0xe   :  { %45 = dma.hbm_to_vmem [thread:$0]  %s4066_s4, 1024, %s40_s25, [#allocation6], %s3739_s29, %s3739_s29, %s3740_s30  }
   0xf   :  { %s3657_s10 = scalar_lea.vmem %s24_s27, 256  ;;  %p3662_p6 = scmp.lt.s32.totalorder %s24_s27, %s24_s27 }
  0x10   :  { %p3658_p5 = scmp.ne.s32.totalorder %s24_s27, %s3657_s10  ;;  %p3663_p7 = scmp.lt.s32.totalorder %s3657_s10, %s3657_s10 }
  0x12   :  { %p3664_p8 = por %p3663_p7, %p3662_p6 }
  0x14   :  { %p3665_p9 = pnand %p3664_p8, %p3658_p5 }
  0x16   :  { %3668 = shalt.err (!%p3665_p9)
}
  0x17   :  { %29 = dma.hbm_to_vmem [thread:$0]  %s4063_s1, 256, %s24_s27, [#allocation3], %s3739_s29, %s3739_s29, %s3740_s30  }
  0x18   :  { %s3741_s13 = smov [#allocation7]   ;;  %s3742_s15 = smov [#allocation8]  }
  0x19   :  { %s51_s14 = sshll.u32 %s3741_s13, 4  ;;  %s63_s16 = sshll.u32 %s3742_s15, 4  ;;  %s52_s14 = int_to_ptr.vmem [resolvable:$true] %s51_s14  ;;  %s64_s16 = int_to_ptr.vmem [resolvable:$true] %s63_s16 }
  0x1a   :  { %s3677_s4 = scalar_lea.vmem %s52_s14, 25088  ;;  %p3682_p11 = scmp.lt.s32.totalorder %s52_s14, %s52_s14 }
  0x1b   :  { %p3678_p10 = scmp.ne.s32.totalorder %s52_s14, %s3677_s4  ;;  %p3683_p12 = scmp.lt.s32.totalorder %s3677_s4, %s3677_s4 }
  0x1d   :  { %p3684_p13 = por %p3683_p12, %p3682_p11 }
  0x1f   :  { %p3685_p0 = pnand %p3684_p13, %p3678_p10 }
  0x21   :  { %3688 = shalt.err (!%p3685_p0)
}
  0x22   :  { %57 = dma.hbm_to_vmem [thread:$0]  %s4067_s5, 25088, %s52_s14, [#allocation6], %s3739_s29, %s3739_s29, %s3740_s30  }
  0x23   :  { %s3697_s1 = scalar_lea.vmem %s64_s16, 2176  ;;  %p3702_p2 = scmp.lt.s32.totalorder %s64_s16, %s64_s16 }
  0x24   :  { %p3698_p1 = scmp.ne.s32.totalorder %s64_s16, %s3697_s1  ;;  %p3703_p3 = scmp.lt.s32.totalorder %s3697_s1, %s3697_s1 }
  0x26   :  { %p3704_p4 = por %p3703_p3, %p3702_p2 }
  0x28   :  { %p3705_p5 = pnand %p3704_p4, %p3698_p1 }
  0x2a   :  { %3708 = shalt.err (!%p3705_p5)
}
  0x2b   :  { %69 = dma.hbm_to_vmem [thread:$0]  %s4068_s6, 2176, %s64_s16, [#allocation9], %s3739_s29, %s3739_s29, %s3740_s30  }
  0x2c   :  { %3729 = dma.done.wait [#allocation3], 256  }
  0x2d   :  { %3730 = vsyncadd [#allocation3], 4294967040 }
  0x2e   :  { %3731 = dma.done.wait [#allocation6], 26112  }
  0x2f   :  { %3732 = vsyncadd [#allocation6], 4294941184 }
  0x30   :  { %3733 = dma.done.wait [#allocation9], 2176  }
  0x31   :  { %3734 = vsyncadd [#allocation9], 4294965120  ;;  %v141_v0 = vld [vmem:[#allocation7 + $0xf8] sm:$0xff]  ;;  %v140_v1 = vld [vmem:[#allocation7 + $0xf0] sm:$0xff]  ;;  %vm453_vm0 = vcmask 130048   ;;  %vm779_vm1 = vcmask 523264  }
  0x32   :  { %2966 = vmatprep.subr.mxu1 %v141_v0  ;;  %v139_v2 = vld [vmem:[#allocation7 + $0xe8] sm:$0xff]  ;;  %v138_v3 = vld [vmem:[#allocation7 + $0xe0] sm:$0xff]  ;;  %v3811_v4 = vld [vmem:[%s4062_s0] sm:$0xff] }
  0x33   :  { %2967 = vmatpush3.msra.mxu1 %v141_v0  ;;  %v137_v5 = vld [vmem:[#allocation7 + $0xd8] sm:$0xff]  ;;  %2998 = vmatprep.mubr.f32.mxu1 %v3811_v4  ;;  %v124_v7 = vld [vmem:[#allocation7 + $0x70] sm:$0xff]  ;;  %v123_v9 = vld [vmem:[#allocation7 + $0x68] sm:$0xff] }
  0x34   :  { %2968 = vmatprep.subr.mxu1 %v140_v1  ;;  %v125_v6 = vld [vmem:[#allocation7 + $0x78] sm:$0xff]  ;;  %v136_v8 = vld [vmem:[#allocation7 + $0xd0] sm:$0xff]  ;;  %v135_v10 = vld [vmem:[#allocation7 + $0xc8] sm:$0xff]  ;;  %2963 = vmatprep.mubr.f32.mxu0 %v3811_v4 }
  0x35   :  { %2969 = vmatpush3.msra.mxu1 %v140_v1  ;;  %2931 = vmatprep.subr.mxu0 %v125_v6  ;;  %v122_v11 = vld [vmem:[#allocation7 + $0x60] sm:$0xff]  ;;  %v121_v13 = vld [vmem:[#allocation7 + $0x58] sm:$0xff]  ;;  %v120_v15 = vld [vmem:[#allocation7 + $0x50] sm:$0xff] }
  0x36   :  { %2970 = vmatprep.subr.mxu1 %v139_v2  ;;  %2932 = vmatpush3.msra.mxu0 %v125_v6  ;;  %v134_v12 = vld [vmem:[#allocation7 + $0xc0] sm:$0xff]  ;;  %v133_v14 = vld [vmem:[#allocation7 + $0xb8] sm:$0xff]  ;;  %v132_v16 = vld [vmem:[#allocation7 + $0xb0] sm:$0xff] }
  0x37   :  { %2971 = vmatpush3.msra.mxu1 %v139_v2  ;;  %2933 = vmatprep.subr.mxu0 %v124_v7  ;;  %v119_v17 = vld [vmem:[#allocation7 + $0x48] sm:$0xff]  ;;  %v118_v19 = vld [vmem:[#allocation7 + $0x40] sm:$0xff]  ;;  %v117_v21 = vld [vmem:[#allocation7 + $0x38] sm:$0xff] }
  0x38   :  { %2972 = vmatprep.subr.mxu1 %v138_v3  ;;  %2934 = vmatpush3.msra.mxu0 %v124_v7  ;;  %v131_v18 = vld [vmem:[#allocation7 + $0xa8] sm:$0xff]  ;;  %v130_v20 = vld [vmem:[#allocation7 + $0xa0] sm:$0xff]  ;;  %v129_v22 = vld [vmem:[#allocation7 + $0x98] sm:$0xff] }
  0x39   :  { %2973 = vmatpush3.msra.mxu1 %v138_v3  ;;  %2935 = vmatprep.subr.mxu0 %v123_v9  ;;  %v116_v23 = vld [vmem:[#allocation7 + $0x30] sm:$0xff]  ;;  %v115_v25 = vld [vmem:[#allocation7 + $0x28] sm:$0xff]  ;;  %v114_v27 = vld [vmem:[#allocation7 + $0x20] sm:$0xff] }
  0x3a   :  { %2974 = vmatprep.subr.mxu1 %v137_v5  ;;  %2936 = vmatpush3.msra.mxu0 %v123_v9  ;;  %v128_v24 = vld [vmem:[#allocation7 + $0x90] sm:$0xff]  ;;  %v127_v26 = vld [vmem:[#allocation7 + $0x88] sm:$0xff]  ;;  %v126_v28 = vld [vmem:[#allocation7 + $0x80] sm:$0xff] }
  0x3b   :  { %2975 = vmatpush3.msra.mxu1 %v137_v5  ;;  %2937 = vmatprep.subr.mxu0 %v122_v11  ;;  %v113_v29 = vld [vmem:[#allocation7 + $0x18] sm:$0xff]  ;;  %v112_v31 = vld [vmem:[#allocation7 + $0x10] sm:$0xff]  ;;  %v111_v32 = vld [vmem:[#allocation7 + $0x8] sm:$0xff] }
  0x3c   :  { %2976 = vmatprep.subr.mxu1 %v136_v8  ;;  %2938 = vmatpush3.msra.mxu0 %v122_v11  ;;  %v3817_v30 = vld [vmem:[%s4062_s0 + $0x8] sm:$0xff]  ;;  %v110_v33 = vld [vmem:[#allocation7] sm:$0xff]  ;;  %v156_v35 = vld [vmem:[#allocation7 + $0x170] sm:$0xff] }
  0x3d   :  { %2977 = vmatpush3.msra.mxu1 %v136_v8  ;;  %2939 = vmatprep.subr.mxu0 %v121_v13  ;;  %v157_v34 = vld [vmem:[#allocation7 + $0x178] sm:$0xff]  ;;  %v155_v36 = vld [vmem:[#allocation7 + $0x168] sm:$0xff]  ;;  %v154_v37 = vld [vmem:[#allocation7 + $0x160] sm:$0xff] }
  0x3e   :  { %2978 = vmatprep.subr.mxu1 %v135_v10  ;;  %2940 = vmatpush3.msra.mxu0 %v121_v13  ;;  %v153_v38 = vld [vmem:[#allocation7 + $0x158] sm:$0xff]  ;;  %v152_v39 = vld [vmem:[#allocation7 + $0x150] sm:$0xff]  ;;  %v151_v40 = vld [vmem:[#allocation7 + $0x148] sm:$0xff] }
  0x3f   :  { %2979 = vmatpush3.msra.mxu1 %v135_v10  ;;  %2941 = vmatprep.subr.mxu0 %v120_v15  ;;  %v150_v41 = vld [vmem:[#allocation7 + $0x140] sm:$0xff]  ;;  %v149_v42 = vld [vmem:[#allocation7 + $0x138] sm:$0xff]  ;;  %v148_v43 = vld [vmem:[#allocation7 + $0x130] sm:$0xff] }
  0x40   :  { %2980 = vmatprep.subr.mxu1 %v134_v12  ;;  %2942 = vmatpush3.msra.mxu0 %v120_v15  ;;  %v147_v44 = vld [vmem:[#allocation7 + $0x128] sm:$0xff]  ;;  %v146_v45 = vld [vmem:[#allocation7 + $0x120] sm:$0xff]  ;;  %v145_v46 = vld [vmem:[#allocation7 + $0x118] sm:$0xff] }
  0x41   :  { %2981 = vmatpush3.msra.mxu1 %v134_v12  ;;  %2943 = vmatprep.subr.mxu0 %v119_v17  ;;  %v144_v47 = vld [vmem:[#allocation7 + $0x110] sm:$0xff]  ;;  %v143_v48 = vld [vmem:[#allocation7 + $0x108] sm:$0xff]  ;;  %v142_v49 = vld [vmem:[#allocation7 + $0x100] sm:$0xff] }
  0x42   :  { %2982 = vmatprep.subr.mxu1 %v133_v14  ;;  %2944 = vmatpush3.msra.mxu0 %v119_v17  ;;  %v86_v50 = vld [vmem:[%s4064_s2] sm:$0xff]  ;;  %v2537_v51 = vld [vmem:[#allocation7 + $0x301] ss:$0 sm:$0xff]  ;;  %v87_v56 = vld [vmem:[%s4064_s2 + $0x8] sm:$0xff] }
  0x43   :  { %2983 = vmatpush3.msra.mxu1 %v133_v14  ;;  %2945 = vmatprep.subr.mxu0 %v118_v19  ;;  %v2536_v57 = vld [vmem:[#allocation7 + $0x300] ss:$0 sm:$0xff]  ;;  %v89_v61 = vld [vmem:[%s4064_s2 + $0x18] sm:$0xff]  ;;  %v90_v62 = vld [vmem:[%s4064_s2 + $0x20] sm:$0xff] }
  0x44   :  { %2984 = vmatprep.subr.mxu1 %v132_v16  ;;  %2946 = vmatpush3.msra.mxu0 %v118_v19  ;;  %v88_v58 = vld [vmem:[%s4064_s2 + $0x10] sm:$0xff]  ;;  %v91_v63 = vld [vmem:[%s4064_s2 + $0x28] sm:$0xff]  ;;  %v93_v1 = vld [vmem:[%s4064_s2 + $0x38] sm:$0xff] }
  0x45   :  { %2985 = vmatpush3.msra.mxu1 %v132_v16  ;;  %2947 = vmatprep.subr.mxu0 %v117_v21  ;;  %v92_v0 = vld [vmem:[%s4064_s2 + $0x30] sm:$0xff]  ;;  %v109_v10 = vld [vmem:[#allocation5 + $0x38] sm:$0xff]  ;;  %v108_v11 = vld [vmem:[#allocation5 + $0x30] sm:$0xff] }
  0x46   :  { %2986 = vmatprep.subr.mxu1 %v131_v18  ;;  %2948 = vmatpush3.msra.mxu0 %v117_v21  ;;  %v2538_v3 = vld [vmem:[#allocation7 + $0x302] ss:$0 sm:$0xff]  ;;  %v107_v12 = vld [vmem:[#allocation5 + $0x28] sm:$0xff]  ;;  %v105_v14 = vld [vmem:[#allocation5 + $0x18] sm:$0xff] }
  0x47   :  { %2987 = vmatpush3.msra.mxu1 %v131_v18  ;;  %2949 = vmatprep.subr.mxu0 %v116_v23  ;;  %v106_v13 = vld [vmem:[#allocation5 + $0x20] sm:$0xff]  ;;  %v104_v15 = vld [vmem:[#allocation5 + $0x10] sm:$0xff]  ;;  %v103_v16 = vld [vmem:[#allocation5 + $0x8] sm:$0xff] }
  0x48   :  { %2988 = vmatprep.subr.mxu1 %v130_v20  ;;  %2950 = vmatpush3.msra.mxu0 %v116_v23  ;;  %v102_v17 = vld [vmem:[#allocation5] sm:$0xff] }
  0x49   :  { %2989 = vmatpush3.msra.mxu1 %v130_v20  ;;  %2951 = vmatprep.subr.mxu0 %v115_v25 }
  0x4a   :  { %2990 = vmatprep.subr.mxu1 %v129_v22  ;;  %2952 = vmatpush3.msra.mxu0 %v115_v25 }
  0x4b   :  { %2991 = vmatpush3.msra.mxu1 %v129_v22  ;;  %2953 = vmatprep.subr.mxu0 %v114_v27 }
  0x4c   :  { %2992 = vmatprep.subr.mxu1 %v128_v24  ;;  %2954 = vmatpush3.msra.mxu0 %v114_v27 }
  0x4d   :  { %2993 = vmatpush3.msra.mxu1 %v128_v24  ;;  %2955 = vmatprep.subr.mxu0 %v113_v29  ;;  %v101_v24 = vld [vmem:[%s4065_s3 + $0x38] sm:$0xff] }
  0x4e   :  { %2994 = vmatprep.subr.mxu1 %v127_v26  ;;  %2956 = vmatpush3.msra.mxu0 %v113_v29 }
  0x4f   :  { %2995 = vmatpush3.msra.mxu1 %v127_v26  ;;  %2957 = vmatprep.subr.mxu0 %v112_v31  ;;  %v3872_v26 = vld [vmem:[%s4065_s3 + $0x30] sm:$0xff] }
  0x50   :  { %2996 = vmatprep.subr.mxu1 %v126_v28  ;;  %2958 = vmatpush3.msra.mxu0 %v112_v31  ;;  %v3878_v31 = vld [vmem:[%s4065_s3 + $0x28] sm:$0xff] }
  0x51   :  { %2997 = vmatpush3.msra.mxu1 %v126_v28  ;;  %2959 = vmatprep.subr.mxu0 %v111_v32 }
  0x52   :  { %2999 = vmatmul.mubr.f32.vlgmr.msra.gmra.mxu1 %v3817_v30  ;;  %2960 = vmatpush3.msra.mxu0 %v111_v32 }
  0x53   :  { %2961 = vmatprep.subr.mxu0 %v110_v33  ;;  %3040 = vmatprep.mubr.msk.f32.mxu1 %vm453_vm0, %v86_v50 }
  0x54   :  { %2962 = vmatpush3.msra.mxu0 %v110_v33  ;;  %v98_v33 = vld [vmem:[%s4065_s3 + $0x20] sm:$0xff] }
  0x55   :  { %3001 = vmatprep.subr.mxu0 %v157_v34  ;;  %2964 = vmatmul.mubr.f32.vlgmr.msra.gmra.mxu0 %v3817_v30 }
  0x56   :  { %3002 = vmatpush3.msra.mxu0 %v157_v34  ;;  %3033 = vmatprep.mubr.f32.mxu0 %v3811_v4 }
  0x57   :  { %3003 = vmatprep.subr.mxu0 %v156_v35 }
  0x58   :  { %3004 = vmatpush3.msra.mxu0 %v156_v35  ;;  %v97_v35 = vld [vmem:[%s4065_s3 + $0x18] sm:$0xff] }
  0x59   :  { %3005 = vmatprep.subr.mxu0 %v155_v36 }
  0x5a   :  { %3006 = vmatpush3.msra.mxu0 %v155_v36 }
  0x5b   :  { %3007 = vmatprep.subr.mxu0 %v154_v37 }
  0x5c   :  { %3008 = vmatpush3.msra.mxu0 %v154_v37  ;;  %v96_v37 = vld [vmem:[%s4065_s3 + $0x10] sm:$0xff] }
  0x5d   :  { %3009 = vmatprep.subr.mxu0 %v153_v38 }
  0x5e   :  { %3010 = vmatpush3.msra.mxu0 %v153_v38 }
  0x5f   :  { %3011 = vmatprep.subr.mxu0 %v152_v39 }
  0x60   :  { %3012 = vmatpush3.msra.mxu0 %v152_v39  ;;  %v95_v39 = vld [vmem:[%s4065_s3 + $0x8] sm:$0xff] }
  0x61   :  { %3013 = vmatprep.subr.mxu0 %v151_v40 }
  0x62   :  { %3014 = vmatpush3.msra.mxu0 %v151_v40 }
  0x63   :  { %3015 = vmatprep.subr.mxu0 %v150_v41 }
  0x64   :  { %3016 = vmatpush3.msra.mxu0 %v150_v41  ;;  %v94_v41 = vld [vmem:[%s4065_s3] sm:$0xff] }
  0x65   :  { %3017 = vmatprep.subr.mxu0 %v149_v42 }
  0x66   :  { %3018 = vmatpush3.msra.mxu0 %v149_v42 }
  0x67   :  { %3019 = vmatprep.subr.mxu0 %v148_v43 }
  0x68   :  { %3020 = vmatpush3.msra.mxu0 %v148_v43 }
  0x69   :  { %3021 = vmatprep.subr.mxu0 %v147_v44 }
  0x6a   :  { %3022 = vmatpush3.msra.mxu0 %v147_v44 }
  0x6b   :  { %3023 = vmatprep.subr.mxu0 %v146_v45 }
  0x6c   :  { %3024 = vmatpush3.msra.mxu0 %v146_v45 }
  0x6d   :  { %3025 = vmatprep.subr.mxu0 %v145_v46 }
  0x6e   :  { %3026 = vmatpush3.msra.mxu0 %v145_v46 }
  0x6f   :  { %3027 = vmatprep.subr.mxu0 %v144_v47 }
  0x70   :  { %3028 = vmatpush3.msra.mxu0 %v144_v47 }
  0x71   :  { %3029 = vmatprep.subr.mxu0 %v143_v48 }
  0x72   :  { %3030 = vmatpush3.msra.mxu0 %v143_v48 }
  0x73   :  { %3031 = vmatprep.subr.mxu0 %v142_v49 }
  0x74   :  { %3032 = vmatpush3.msra.mxu0 %v142_v49 }
  0x75   :  { %3034 = vmatmul.mubr.f32.vlgmr.msra.gmra.mxu0 %v3817_v30  ;;  %3087 = vmatprep.subr.mxu0 %v109_v10 }
  0x76   :  { %3088 = vmatpush3.msra.mxu0 %v109_v10 }
  0x77   :  { %3089 = vmatprep.subr.mxu0 %v108_v11 }
  0x78   :  { %3090 = vmatpush3.msra.mxu0 %v108_v11 }
  0x79   :  { %3091 = vmatprep.subr.mxu0 %v107_v12 }
  0x7a   :  { %3092 = vmatpush3.msra.mxu0 %v107_v12  ;;  %v173_v12 = vld [vmem:[#allocation7 + $0x1f8] sm:$0xff] }
  0x7b   :  { %3093 = vmatprep.subr.mxu0 %v106_v13 }
  0x7c   :  { %3094 = vmatpush3.msra.mxu0 %v106_v13  ;;  %v172_v13 = vld [vmem:[#allocation7 + $0x1f0] sm:$0xff] }
  0x7d   :  { %3095 = vmatprep.subr.mxu0 %v105_v14 }
  0x7e   :  { %3096 = vmatpush3.msra.mxu0 %v105_v14  ;;  %v171_v14 = vld [vmem:[#allocation7 + $0x1e8] sm:$0xff] }
  0x7f   :  { %3097 = vmatprep.subr.mxu0 %v104_v15 }
  0x80   :  { %3098 = vmatpush3.msra.mxu0 %v104_v15  ;;  %v170_v15 = vld [vmem:[#allocation7 + $0x1e0] sm:$0xff] }
  0x81   :  { %3099 = vmatprep.subr.mxu0 %v103_v16 }
  0x82   :  { %3100 = vmatpush3.msra.mxu0 %v103_v16  ;;  %v169_v16 = vld [vmem:[#allocation7 + $0x1d8] sm:$0xff] }
  0x83   :  { %3101 = vmatprep.subr.mxu0 %v102_v17 }
  0x84   :  { %3102 = vmatpush3.msra.mxu0 %v102_v17  ;;  %v168_v17 = vld [vmem:[#allocation7 + $0x1d0] sm:$0xff] }
 0x112   :  { %v3000_v52 = vpop.f32.mrf.mxu1 }
 0x113   :  { %v371_v53 = vadd.f32 %v3000_v52, %v2537_v51 }
 0x114   :  { %v365_v54 = vpop.f32.mrf.mxu1 }
 0x115   :  { %v366_v55 = vadd.f32 %v2537_v51, %v365_v54  ;;  %3036 = vmatprep.subr.mxu1 %v371_v53  ;;  %v2965_v59 = vpop.f32.mrf.mxu0  ;;  %v85_v54 = vld [vmem:[#allocation2 + $0x8] sm:$0xff] }
 0x116   :  { %3037 = vmatpush3.msra.mxu1 %v371_v53  ;;  %v3835_v60 = vadd.f32 %v2965_v59, %v2536_v57  ;;  %v84_v53 = vld [vmem:[#allocation2] sm:$0xff] }
 0x117   :  { %3038 = vmatprep.subr.mxu1 %v366_v55  ;;  %v286_v2 = vpop.f32.mrf.mxu0 }
 0x118   :  { %3039 = vmatpush3.msra.mxu1 %v366_v55  ;;  %v287_v9 = vadd.f32 %v2536_v57, %v286_v2 }
 0x119   :  { %3041 = vmatmul.mubr.msk.f32.vlgmr.msra.gmra.mxu1 %vm453_vm0, %v87_v56 }
 0x11a   :  { %3043 = vmatprep.mubr.msk.f32.mxu1 %vm453_vm0, %v88_v58 }
 0x11d   :  { %3044 = vmatmul.mubr.msk.f32.gmra.mxu1 %vm453_vm0, %v89_v61 }
 0x11e   :  { %3046 = vmatprep.mubr.msk.f32.mxu1 %vm453_vm0, %v90_v62 }
 0x121   :  { %3047 = vmatmul.mubr.msk.f32.gmra.mxu1 %vm453_vm0, %v91_v63 }
 0x122   :  { %3049 = vmatprep.mubr.msk.f32.mxu1 %vm453_vm0, %v92_v0 }
 0x125   :  { %3050 = vmatmul.mubr.msk.f32.gmra.mxu1 %vm453_vm0, %v93_v1 }
 0x126   :  { %3056 = vmatprep.mubr.msk.f32.mxu1 %vm453_vm0, %v86_v50 }
 0x135   :  { %v3035_v5 = vpop.f32.mrf.mxu0 }
 0x136   :  { %v450_v6 = vadd.f32 %v3035_v5, %v2538_v3 }
 0x137   :  { %v444_v7 = vpop.f32.mrf.mxu0 }
 0x138   :  { %v445_v8 = vadd.f32 %v2538_v3, %v444_v7  ;;  %3052 = vmatprep.subr.mxu1 %v450_v6 }
 0x139   :  { %3053 = vmatpush3.msra.mxu1 %v450_v6 }
 0x13a   :  { %3054 = vmatprep.subr.mxu1 %v445_v8 }
 0x13b   :  { %3055 = vmatpush3.msra.mxu1 %v445_v8 }
 0x13c   :  { %3057 = vmatmul.mubr.msk.f32.vlgmr.msra.gmra.mxu1 %vm453_vm0, %v87_v56 }
 0x13d   :  { %3059 = vmatprep.mubr.msk.f32.mxu1 %vm453_vm0, %v88_v58 }
 0x140   :  { %3060 = vmatmul.mubr.msk.f32.gmra.mxu1 %vm453_vm0, %v89_v61 }
 0x141   :  { %3062 = vmatprep.mubr.msk.f32.mxu1 %vm453_vm0, %v90_v62 }
 0x144   :  { %3063 = vmatmul.mubr.msk.f32.gmra.mxu1 %vm453_vm0, %v91_v63 }
 0x145   :  { %3065 = vmatprep.mubr.msk.f32.mxu1 %vm453_vm0, %v92_v0 }
 0x148   :  { %3066 = vmatmul.mubr.msk.f32.gmra.mxu1 %vm453_vm0, %v93_v1 }
 0x149   :  { %3084 = vmatprep.mubr.f32.mxu1 %v287_v9 }
 0x1d9   :  { %v3042_v18 = vpop.f32.mrf.mxu1 }
 0x1da   :  { %v584_v40 = vmul.f32 %v3042_v18, %v95_v39  ;;  %v167_v18 = vld [vmem:[#allocation7 + $0x1c8] sm:$0xff] }
 0x1db   :  { %v544_v19 = vpop.f32.mrf.mxu1 }
 0x1dc   :  { %v583_v43 = vmul.f32 %v544_v19, %v94_v41  ;;  %v166_v19 = vld [vmem:[#allocation7 + $0x1c0] sm:$0xff] }
 0x1dd   :  { %v3045_v20 = vpop.f32.mrf.mxu1 }
 0x1de   :  { %v586_v36 = vmul.f32 %v3045_v20, %v97_v35  ;;  %v165_v20 = vld [vmem:[#allocation7 + $0x1b8] sm:$0xff] }
 0x1df   :  { %v554_v21 = vpop.f32.mrf.mxu1 }
 0x1e0   :  { %v585_v38 = vmul.f32 %v554_v21, %v96_v37  ;;  %v164_v21 = vld [vmem:[#allocation7 + $0x1b0] sm:$0xff] }
 0x1e1   :  { %v3048_v22 = vpop.f32.mrf.mxu1 }
 0x1e2   :  { %v588_v32 = vmul.f32 %v3048_v22, %v3878_v31  ;;  %v163_v22 = vld [vmem:[#allocation7 + $0x1a8] sm:$0xff] }
 0x1e3   :  { %v564_v23 = vpop.f32.mrf.mxu1 }
 0x1e4   :  { %v587_v34 = vmul.f32 %v564_v23, %v98_v33  ;;  %v162_v23 = vld [vmem:[#allocation7 + $0x1a0] sm:$0xff] }
 0x1e5   :  { %v3051_v25 = vpop.f32.mrf.mxu1 }
 0x1e6   :  { %v590_v27 = vmul.f32 %v3051_v25, %v101_v24  ;;  %v160_v25 = vld [vmem:[#allocation7 + $0x190] sm:$0xff] }
 0x1e7   :  { %v574_v28 = vpop.f32.mrf.mxu1 }
 0x1e8   :  { %v589_v29 = vmul.f32 %v574_v28, %v3872_v26  ;;  %3068 = vmatprep.subr.mxu1 %v590_v27 }
 0x1e9   :  { %3069 = vmatpush3.xpose.msra.mxu1 %v590_v27 }
 0x1ea   :  { %3070 = vmatprep.subr.mxu1 %v589_v29 }
 0x1ed   :  { %3071 = vmatpush3.xpose.msra.mxu1 %v589_v29 }
 0x1ee   :  { %3072 = vmatprep.subr.mxu1 %v588_v32 }
 0x1f1   :  { %3073 = vmatpush3.xpose.msra.mxu1 %v588_v32 }
 0x1f2   :  { %3074 = vmatprep.subr.mxu1 %v587_v34 }
 0x1f5   :  { %3075 = vmatpush3.xpose.msra.mxu1 %v587_v34 }
 0x1f6   :  { %3076 = vmatprep.subr.mxu1 %v586_v36 }
 0x1f9   :  { %3077 = vmatpush3.xpose.msra.mxu1 %v586_v36  ;;  %v158_v36 = vld [vmem:[#allocation7 + $0x180] sm:$0xff] }
 0x1fa   :  { %3078 = vmatprep.subr.mxu1 %v585_v38 }
 0x1fc   :  { %v3058_v42 = vpop.f32.mrf.mxu1 }
 0x1fd   :  { %3079 = vmatpush3.xpose.msra.mxu1 %v585_v38  ;;  %v697_v10 = vmul.f32 %v3058_v42, %v95_v39  ;;  %v2559_v39 = vld [vmem:[#allocation7 + $0x303] ss:$0 sm:$0xff] }
 0x1fe   :  { %3080 = vmatprep.subr.mxu1 %v584_v40  ;;  %v657_v44 = vpop.f32.mrf.mxu1 }
 0x1ff   :  { %v696_v11 = vmul.f32 %v657_v44, %v94_v41 }
 0x200   :  { %v3061_v45 = vpop.f32.mrf.mxu1 }
 0x201   :  { %3081 = vmatpush3.xpose.msra.mxu1 %v584_v40  ;;  %v699_v8 = vmul.f32 %v3061_v45, %v97_v35  ;;  %v159_v35 = vld [vmem:[#allocation7 + $0x188] sm:$0xff] }
 0x202   :  { %3082 = vmatprep.subr.mxu1 %v583_v43  ;;  %v667_v46 = vpop.f32.mrf.mxu1 }
 0x203   :  { %v698_v9 = vmul.f32 %v667_v46, %v96_v37 }
 0x204   :  { %v3064_v47 = vpop.f32.mrf.mxu1 }
 0x205   :  { %3083 = vmatpush3.xpose.msra.mxu1 %v583_v43  ;;  %v701_v6 = vmul.f32 %v3064_v47, %v3878_v31 }
 0x206   :  { %v677_v48 = vpop.f32.mrf.mxu1  ;;  %3125 = vmatprep.subr.mxu1 %v173_v12 }
 0x207   :  { %v700_v7 = vmul.f32 %v677_v48, %v98_v33  ;;  %v189_v48 = vld [vmem:[#allocation7 + $0x278] sm:$0xff] }
 0x208   :  { %3085 = vmatmul.mubr.f32.vlgmr.msra.gmra.mxu1 %v3835_v60  ;;  %v3067_v49 = vpop.f32.mrf.mxu1 }
 0x209   :  { %v703_v50 = vmul.f32 %v3067_v49, %v101_v24  ;;  %3126 = vmatpush3.msra.mxu1 %v173_v12  ;;  %v161_v24 = vld [vmem:[#allocation7 + $0x198] sm:$0xff]  ;;  %v186_v49 = vld [vmem:[#allocation7 + $0x260] sm:$0xff] }
 0x20a   :  { %v687_v51 = vpop.f32.mrf.mxu1  ;;  %3127 = vmatprep.subr.mxu1 %v172_v13 }
 0x20b   :  { %3106 = vmatprep.subr.mxu0 %v703_v50  ;;  %v702_v5 = vmul.f32 %v687_v51, %v3872_v26  ;;  %3128 = vmatpush3.msra.mxu1 %v172_v13  ;;  %v184_v51 = vld [vmem:[#allocation7 + $0x250] sm:$0xff] }
 0x20c   :  { %3129 = vmatprep.subr.mxu1 %v171_v14 }
 0x20d   :  { %3130 = vmatpush3.msra.mxu1 %v171_v14 }
 0x20e   :  { %3131 = vmatprep.subr.mxu1 %v170_v15 }
 0x20f   :  { %3132 = vmatpush3.msra.mxu1 %v170_v15 }
 0x210   :  { %3133 = vmatprep.subr.mxu1 %v169_v16 }
 0x211   :  { %3134 = vmatpush3.msra.mxu1 %v169_v16 }
 0x212   :  { %3135 = vmatprep.subr.mxu1 %v168_v17 }
 0x213   :  { %3136 = vmatpush3.msra.mxu1 %v168_v17 }
 0x214   :  { %3137 = vmatprep.subr.mxu1 %v167_v18 }
 0x215   :  { %3138 = vmatpush3.msra.mxu1 %v167_v18 }
 0x216   :  { %3139 = vmatprep.subr.mxu1 %v166_v19 }
 0x217   :  { %3140 = vmatpush3.msra.mxu1 %v166_v19 }
 0x218   :  { %3141 = vmatprep.subr.mxu1 %v165_v20 }
 0x219   :  { %3142 = vmatpush3.msra.mxu1 %v165_v20 }
 0x21a   :  { %3143 = vmatprep.subr.mxu1 %v164_v21 }
 0x21b   :  { %3144 = vmatpush3.msra.mxu1 %v164_v21 }
 0x21c   :  { %3145 = vmatprep.subr.mxu1 %v163_v22 }
 0x21d   :  { %3146 = vmatpush3.msra.mxu1 %v163_v22 }
 0x21e   :  { %3147 = vmatprep.subr.mxu1 %v162_v23 }
 0x21f   :  { %3148 = vmatpush3.msra.mxu1 %v162_v23 }
 0x220   :  { %3149 = vmatprep.subr.mxu1 %v161_v24 }
 0x221   :  { %3150 = vmatpush3.msra.mxu1 %v161_v24 }
 0x222   :  { %3151 = vmatprep.subr.mxu1 %v160_v25 }
 0x223   :  { %3152 = vmatpush3.msra.mxu1 %v160_v25 }
 0x224   :  { %3153 = vmatprep.subr.mxu1 %v159_v35 }
 0x225   :  { %3154 = vmatpush3.msra.mxu1 %v159_v35 }
 0x226   :  { %3155 = vmatprep.subr.mxu1 %v158_v36 }
 0x227   :  { %3156 = vmatpush3.msra.mxu1 %v158_v36 }
 0x2c8   :  { %v3086_v52 = vpop.f32.mrf.mxu1 }
 0x2c9   :  { %v776_v57 = vadd.f32 %v3086_v52, %v85_v54  ;;  %v183_v52 = vld [vmem:[#allocation7 + $0x248] sm:$0xff]  ;;  %v181_v54 = vld [vmem:[#allocation7 + $0x238] sm:$0xff] }
 0x2ca   :  { %v770_v55 = vpop.f32.mrf.mxu1 }
 0x2cb   :  { %v771_v56 = vadd.f32 %v770_v55, %v84_v53  ;;  %v783_v59 = vsel %vm779_vm1, %v776_v57, -inf  ;;  %v182_v53 = vld [vmem:[#allocation7 + $0x240] sm:$0xff]  ;;  %v180_v55 = vld [vmem:[#allocation7 + $0x230] sm:$0xff] }
 0x2cd   :  { %v780_v58 = vsel %vm779_vm1, %v771_v56, -inf }
 0x2ce   :  { %781 = vmax.xlane.f32.xlu0 %v780_v58  ;;  %v177_v58 = vld [vmem:[#allocation7 + $0x218] sm:$0xff] }
 0x2d2   :  { %784 = vmax.xlane.f32.xlu0 %v783_v59  ;;  %v176_v59 = vld [vmem:[#allocation7 + $0x210] sm:$0xff] }
 0x357   :  { %v782_v61 = vpop.xlane.xlu0 %781 }
 0x358   :  { %v786_v60 = vsub.f32 %v771_v56, %v782_v61  ;;  %v179_v56 = vld [vmem:[#allocation7 + $0x228] sm:$0xff] }
 0x359   :  { %v175_v61 = vld [vmem:[#allocation7 + $0x208] sm:$0xff] }
 0x35a   :  { %v788_v62 = vmul.f32 1.442695, %v786_v60  ;;  %v174_v60 = vld [vmem:[#allocation7 + $0x200] sm:$0xff] }
 0x35b   :  { %v785_v63 = vpop.xlane.xlu0 %784 }
 0x35c   :  { %3571 = vpow2.f32 %v788_v62  ;;  %v787_v0 = vsub.f32 %v776_v57, %v785_v63  ;;  %v178_v57 = vld [vmem:[#allocation7 + $0x220] sm:$0xff]  ;;  %v205_v62 = vld [vmem:[#allocation7 + $0x2f8] sm:$0xff]  ;;  %v204_v63 = vld [vmem:[#allocation7 + $0x2f0] sm:$0xff] }
 0x35d   :  { %3195 = vmatprep.subr.mxu1 %v205_v62 }
 0x35e   :  { %v790_v1 = vmul.f32 1.442695, %v787_v0  ;;  %v203_v0 = vld [vmem:[#allocation7 + $0x2e8] sm:$0xff] }
 0x360   :  { %3573 = vpow2.f32 %v790_v1  ;;  %v202_v1 = vld [vmem:[#allocation7 + $0x2e0] sm:$0xff] }
 0x369   :  { %v3899_v2 = vpop.eup %3571 }
 0x36a   :  { %3103 = vmatprep.mubr.msk.f32.mxu0 %vm779_vm1, %v3899_v2 }
 0x36d   :  { %v3903_v3 = vpop.eup %3573 }
 0x36e   :  { %3104 = vmatmul.mubr.msk.f32.vlgmr.msra.gmra.mxu0 %vm779_vm1, %v3903_v3 }
 0x36f   :  { %3107 = vmatpush3.msra.mxu0 %v703_v50  ;;  %v185_v50 = vld [vmem:[#allocation7 + $0x258] sm:$0xff] }
 0x370   :  { %3108 = vmatprep.subr.mxu0 %v702_v5 }
 0x371   :  { %3109 = vmatpush3.msra.mxu0 %v702_v5  ;;  %v199_v5 = vld [vmem:[#allocation7 + $0x2c8] sm:$0xff] }
 0x372   :  { %3110 = vmatprep.subr.mxu0 %v701_v6 }
 0x373   :  { %3111 = vmatpush3.msra.mxu0 %v701_v6  ;;  %v198_v6 = vld [vmem:[#allocation7 + $0x2c0] sm:$0xff] }
 0x374   :  { %3112 = vmatprep.subr.mxu0 %v700_v7 }
 0x375   :  { %3113 = vmatpush3.msra.mxu0 %v700_v7  ;;  %v197_v7 = vld [vmem:[#allocation7 + $0x2b8] sm:$0xff] }
 0x376   :  { %3114 = vmatprep.subr.mxu0 %v699_v8 }
 0x377   :  { %3115 = vmatpush3.msra.mxu0 %v699_v8  ;;  %v196_v8 = vld [vmem:[#allocation7 + $0x2b0] sm:$0xff] }
 0x378   :  { %3116 = vmatprep.subr.mxu0 %v698_v9 }
 0x379   :  { %3117 = vmatpush3.msra.mxu0 %v698_v9  ;;  %v195_v9 = vld [vmem:[#allocation7 + $0x2a8] sm:$0xff] }
 0x37a   :  { %3118 = vmatprep.subr.mxu0 %v697_v10 }
 0x37b   :  { %3119 = vmatpush3.msra.mxu0 %v697_v10  ;;  %v194_v10 = vld [vmem:[#allocation7 + $0x2a0] sm:$0xff] }
 0x37c   :  { %3120 = vmatprep.subr.mxu0 %v696_v11 }
 0x37d   :  { %3121 = vmatpush3.msra.mxu0 %v696_v11 }
 0x37e   :  { %3160 = vmatprep.subr.mxu0 %v189_v48 }
 0x42e   :  { %v3105_v26 = vpop.f32.mrf.mxu0 }
 0x42f   :  { %v870_v27 = vadd.f32 1e-09, %v3105_v26 }
 0x430   :  { %v864_v28 = vpop.f32.mrf.mxu0 }
 0x431   :  { %v865_v29 = vadd.f32 1e-09, %v864_v28  ;;  %3575 = vrcp.f32 %v870_v27  ;;  %v2560_v27 = vld [vmem:[#allocation7 + $0x306] ss:$0 sm:$0xff] }
 0x433   :  { %3577 = vrcp.f32 %v865_v29 }
 0x43e   :  { %v3576_v31 = vpop.eup %3575 }
 0x43f   :  { %v876_v34 = vmul.f32 %v3576_v31, %v3903_v3  ;;  %v200_v3 = vld [vmem:[#allocation7 + $0x2d0] sm:$0xff] }
 0x440   :  { %v3578_v32 = vpop.eup %3577 }
 0x441   :  { %v875_v33 = vmul.f32 %v3578_v32, %v3899_v2  ;;  %v201_v2 = vld [vmem:[#allocation7 + $0x2d8] sm:$0xff]  ;;  %v2561_v32 = vld [vmem:[#allocation7 + $0x307] ss:$0 sm:$0xff] }
 0x443   :  { %3122 = vmatprep.mubr.msk.f32.mxu0 %vm779_vm1, %v875_v33 }
 0x444   :  { %3123 = vmatmul.mubr.msk.f32.vlgmr.msra.gmra.mxu0 %vm779_vm1, %v876_v34 }
 0x445   :  { %3161 = vmatpush3.msra.mxu0 %v189_v48 }
 0x504   :  { %v3124_v37 = vpop.f32.mrf.mxu0 }
 0x506   :  { %v949_v38 = vpop.f32.mrf.mxu0 }
 0x507   :  { %3157 = vmatprep.mubr.f32.mxu1 %v949_v38  ;;  %v193_v38 = vld [vmem:[#allocation7 + $0x298] sm:$0xff] }
 0x508   :  { %3158 = vmatmul.mubr.f32.vlgmr.msra.gmra.mxu1 %v3124_v37 }
 0x509   :  { %3196 = vmatpush3.msra.mxu1 %v205_v62  ;;  %v1290_v62 = vld [vmem:[#allocation7 + $0x370] sm:$0xff] }
 0x50a   :  { %3197 = vmatprep.subr.mxu1 %v204_v63 }
 0x50b   :  { %3198 = vmatpush3.msra.mxu1 %v204_v63  ;;  %v1306_v63 = vld [vmem:[#allocation7 + $0x3f0] sm:$0xff] }
 0x50c   :  { %3199 = vmatprep.subr.mxu1 %v203_v0 }
 0x50d   :  { %3200 = vmatpush3.msra.mxu1 %v203_v0  ;;  %v1289_v0 = vld [vmem:[#allocation7 + $0x368] sm:$0xff] }
 0x50e   :  { %3201 = vmatprep.subr.mxu1 %v202_v1 }
 0x50f   :  { %3202 = vmatpush3.msra.mxu1 %v202_v1  ;;  %v1305_v1 = vld [vmem:[#allocation7 + $0x3e8] sm:$0xff] }
 0x510   :  { %3203 = vmatprep.subr.mxu1 %v201_v2 }
 0x511   :  { %3204 = vmatpush3.msra.mxu1 %v201_v2  ;;  %v1288_v2 = vld [vmem:[#allocation7 + $0x360] sm:$0xff] }
 0x512   :  { %3205 = vmatprep.subr.mxu1 %v200_v3 }
 0x513   :  { %3206 = vmatpush3.msra.mxu1 %v200_v3  ;;  %v1304_v3 = vld [vmem:[#allocation7 + $0x3e0] sm:$0xff] }
 0x514   :  { %3207 = vmatprep.subr.mxu1 %v199_v5 }
 0x515   :  { %3208 = vmatpush3.msra.mxu1 %v199_v5  ;;  %v1287_v5 = vld [vmem:[#allocation7 + $0x358] sm:$0xff] }
 0x516   :  { %3209 = vmatprep.subr.mxu1 %v198_v6 }
 0x517   :  { %3210 = vmatpush3.msra.mxu1 %v198_v6  ;;  %v1303_v6 = vld [vmem:[#allocation7 + $0x3d8] sm:$0xff] }
 0x518   :  { %3211 = vmatprep.subr.mxu1 %v197_v7 }
 0x519   :  { %3212 = vmatpush3.msra.mxu1 %v197_v7  ;;  %v1286_v7 = vld [vmem:[#allocation7 + $0x350] sm:$0xff] }
 0x51a   :  { %3213 = vmatprep.subr.mxu1 %v196_v8 }
 0x51b   :  { %3214 = vmatpush3.msra.mxu1 %v196_v8  ;;  %v1302_v8 = vld [vmem:[#allocation7 + $0x3d0] sm:$0xff] }
 0x51c   :  { %3215 = vmatprep.subr.mxu1 %v195_v9 }
 0x51d   :  { %3216 = vmatpush3.msra.mxu1 %v195_v9  ;;  %v1285_v9 = vld [vmem:[#allocation7 + $0x348] sm:$0xff] }
 0x51e   :  { %3217 = vmatprep.subr.mxu1 %v194_v10 }
 0x51f   :  { %3218 = vmatpush3.msra.mxu1 %v194_v10  ;;  %v1301_v10 = vld [vmem:[#allocation7 + $0x3c8] sm:$0xff] }
 0x520   :  { %3219 = vmatprep.subr.mxu1 %v193_v38 }
 0x521   :  { %3220 = vmatpush3.msra.mxu1 %v193_v38 }
 0x5c8   :  { %v3159_v40 = vpop.f32.mrf.mxu1 }
 0x5c9   :  { %v1034_v41 = vadd.f32 %v3159_v40, %v2559_v39  ;;  %v191_v40 = vld [vmem:[#allocation7 + $0x288] sm:$0xff] }
 0x5ca   :  { %v1028_v42 = vpop.f32.mrf.mxu1 }
 0x5cb   :  { %v3914_v43 = vadd.f32 %v1034_v41, %v3817_v30  ;;  %v1029_v44 = vadd.f32 %v2559_v39, %v1028_v42  ;;  %v188_v30 = vld [vmem:[#allocation7 + $0x270] sm:$0xff]  ;;  %v190_v41 = vld [vmem:[#allocation7 + $0x280] sm:$0xff] }
 0x5cc   :  { %3162 = vmatprep.subr.mxu0 %v188_v30  ;;  %v192_v39 = vld [vmem:[#allocation7 + $0x290] sm:$0xff]  ;;  %v2562_v42 = vld [vmem:[#allocation7 + $0x304] ss:$0 sm:$0xff] }
 0x5cd   :  { %v3917_v45 = vadd.f32 %v1029_v44, %v3811_v4  ;;  %1041 = vadd.xlane.f32.xlu1 %v3914_v43  ;;  %v1046_v47 = vmul.f32 %v3914_v43, %v3914_v43  ;;  %3163 = vmatpush3.msra.mxu0 %v188_v30  ;;  %v187_v4 = vld [vmem:[#allocation7 + $0x268] sm:$0xff]  ;;  %v2563_v30 = vld [vmem:[#allocation7 + $0x305] ss:$0 sm:$0xff] }
 0x5ce   :  { %3164 = vmatprep.subr.mxu0 %v187_v4  ;;  %3221 = vmatprep.subr.mxu1 %v192_v39 }
 0x5cf   :  { %v1045_v46 = vmul.f32 %v3917_v45, %v3917_v45  ;;  %3165 = vmatpush3.msra.mxu0 %v187_v4  ;;  %3222 = vmatpush3.msra.mxu1 %v192_v39 }
 0x5d0   :  { %3166 = vmatprep.subr.mxu0 %v186_v49  ;;  %3223 = vmatprep.subr.mxu1 %v191_v40 }
 0x5d1   :  { %1039 = vadd.xlane.f32.xlu1 %v3917_v45  ;;  %1047 = vadd.xlane.f32.xlu0 %v1045_v46 }
 0x5d2   :  { %3167 = vmatpush3.msra.mxu0 %v186_v49  ;;  %3224 = vmatpush3.msra.mxu1 %v191_v40 }
 0x5d3   :  { %3168 = vmatprep.subr.mxu0 %v185_v50  ;;  %3225 = vmatprep.subr.mxu1 %v190_v41 }
 0x5d4   :  { %3169 = vmatpush3.msra.mxu0 %v185_v50  ;;  %3226 = vmatpush3.msra.mxu1 %v190_v41 }
 0x5d5   :  { %1049 = vadd.xlane.f32.xlu1 %v1046_v47  ;;  %3170 = vmatprep.subr.mxu0 %v184_v51 }
 0x5d6   :  { %3171 = vmatpush3.msra.mxu0 %v184_v51 }
 0x5d7   :  { %3172 = vmatprep.subr.mxu0 %v183_v52 }
 0x5d8   :  { %3173 = vmatpush3.msra.mxu0 %v183_v52 }
 0x5d9   :  { %3174 = vmatprep.subr.mxu0 %v182_v53 }
 0x5da   :  { %3175 = vmatpush3.msra.mxu0 %v182_v53 }
 0x5db   :  { %3176 = vmatprep.subr.mxu0 %v181_v54 }
 0x5dc   :  { %3177 = vmatpush3.msra.mxu0 %v181_v54 }
 0x5dd   :  { %3178 = vmatprep.subr.mxu0 %v180_v55 }
 0x5de   :  { %3179 = vmatpush3.msra.mxu0 %v180_v55 }
 0x5df   :  { %3180 = vmatprep.subr.mxu0 %v179_v56 }
 0x5e0   :  { %3181 = vmatpush3.msra.mxu0 %v179_v56  ;;  %v1293_v56 = vld [vmem:[#allocation7 + $0x388] sm:$0xff] }
 0x5e1   :  { %3182 = vmatprep.subr.mxu0 %v178_v57 }
 0x5e2   :  { %3183 = vmatpush3.msra.mxu0 %v178_v57  ;;  %v1309_v57 = vld [vmem:[#allocation7 + $0x408] sm:$0xff] }
 0x5e3   :  { %3184 = vmatprep.subr.mxu0 %v177_v58  ;;  %3265 = vmatprep.subr.mxu1 %v1309_v57 }
 0x5e4   :  { %3185 = vmatpush3.msra.mxu0 %v177_v58  ;;  %v1292_v58 = vld [vmem:[#allocation7 + $0x380] sm:$0xff] }
 0x5e5   :  { %3186 = vmatprep.subr.mxu0 %v176_v59 }
 0x5e6   :  { %3187 = vmatpush3.msra.mxu0 %v176_v59  ;;  %v1308_v59 = vld [vmem:[#allocation7 + $0x400] sm:$0xff] }
 0x5e7   :  { %3188 = vmatprep.subr.mxu0 %v175_v61 }
 0x5e8   :  { %3189 = vmatpush3.msra.mxu0 %v175_v61  ;;  %v1291_v61 = vld [vmem:[#allocation7 + $0x378] sm:$0xff] }
 0x5e9   :  { %3190 = vmatprep.subr.mxu0 %v174_v60 }
 0x5ea   :  { %3191 = vmatpush3.msra.mxu0 %v174_v60  ;;  %v1307_v60 = vld [vmem:[#allocation7 + $0x3f8] sm:$0xff] }
 0x5eb   :  { %3230 = vmatprep.subr.mxu0 %v1293_v56 }
 0x656   :  { %v1042_v11 = vpop.xlane.xlu1 %1041 }
 0x657   :  { %v1044_v14 = vmul.f32 0.03125, %v1042_v11  ;;  %v1284_v11 = vld [vmem:[#allocation7 + $0x340] sm:$0xff] }
 0x659   :  { %v1054_v19 = vmul.f32 %v1044_v14, %v1044_v14  ;;  %v1058_v28 = vsub.f32 %v3914_v43, %v1044_v14  ;;  %v1299_v14 = vld [vmem:[#allocation7 + $0x3b8] sm:$0xff] }
 0x65a   :  { %v1040_v12 = vpop.xlane.xlu1 %1039  ;;  %v1048_v13 = vpop.xlane.xlu0 %1047 }
 0x65b   :  { %v1043_v15 = vmul.f32 0.03125, %v1040_v12  ;;  %v1051_v17 = vmul.f32 0.03125, %v1048_v13  ;;  %v1300_v12 = vld [vmem:[#allocation7 + $0x3c0] sm:$0xff]  ;;  %v1283_v13 = vld [vmem:[#allocation7 + $0x338] sm:$0xff] }
 0x65d   :  { %v1053_v16 = vmul.f32 %v1043_v15, %v1043_v15  ;;  %v1057_v25 = vsub.f32 %v3917_v45, %v1043_v15  ;;  %v1282_v15 = vld [vmem:[#allocation7 + $0x330] sm:$0xff] }
 0x65e   :  { %v1050_v18 = vpop.xlane.xlu1 %1049 }
 0x65f   :  { %v1055_v20 = vsub.f32 %v1051_v17, %v1053_v16  ;;  %v1052_v21 = vmul.f32 0.03125, %v1050_v18  ;;  %v1298_v16 = vld [vmem:[#allocation7 + $0x3b0] sm:$0xff]  ;;  %v1281_v17 = vld [vmem:[#allocation7 + $0x328] sm:$0xff] }
 0x660   :  { %v1297_v18 = vld [vmem:[#allocation7 + $0x3a8] sm:$0xff] }
 0x661   :  { %v1059_v22 = vadd.f32 1e-05, %v1055_v20  ;;  %v1056_v23 = vsub.f32 %v1052_v21, %v1054_v19  ;;  %v1280_v19 = vld [vmem:[#allocation7 + $0x320] sm:$0xff]  ;;  %v1279_v21 = vld [vmem:[#allocation7 + $0x318] sm:$0xff] }
 0x662   :  { %v1296_v20 = vld [vmem:[#allocation7 + $0x3a0] sm:$0xff] }
 0x663   :  { %3579 = vrsqrt.f32 %v1059_v22  ;;  %v1060_v24 = vadd.f32 1e-05, %v1056_v23  ;;  %v1295_v22 = vld [vmem:[#allocation7 + $0x398] sm:$0xff]  ;;  %v1278_v23 = vld [vmem:[#allocation7 + $0x310] sm:$0xff] }
 0x665   :  { %3581 = vrsqrt.f32 %v1060_v24  ;;  %v1294_v24 = vld [vmem:[#allocation7 + $0x390] sm:$0xff] }
 0x670   :  { %v3580_v26 = vpop.eup %3579 }
 0x671   :  { %v1063_v29 = vmul.f32 %v3580_v26, %v1057_v25  ;;  %v1325_v25 = vld [vmem:[#allocation7 + $0x488] sm:$0xff] }
 0x672   :  { %v3582_v31 = vpop.eup %3581 }
 0x673   :  { %v1064_v33 = vmul.f32 %v3582_v31, %v1058_v28  ;;  %v1069_v34 = vmul.f32 %v2560_v27, %v1063_v29 }
 0x675   :  { %v1070_v35 = vmul.f32 %v2560_v27, %v1064_v33  ;;  %v1075_v36 = vadd.f32 %v2561_v32, %v1069_v34 }
 0x677   :  { %v1076_v37 = vadd.f32 %v2561_v32, %v1070_v35  ;;  %3192 = vmatprep.mubr.f32.mxu0 %v1075_v36 }
 0x679   :  { %3193 = vmatmul.mubr.f32.vlgmr.msra.gmra.mxu0 %v1076_v37 }
 0x67a   :  { %3231 = vmatpush3.msra.mxu0 %v1293_v56  ;;  %v1320_v56 = vld [vmem:[#allocation7 + $0x460] sm:$0xff] }
 0x67b   :  { %3232 = vmatprep.subr.mxu0 %v1292_v58 }
 0x67c   :  { %3233 = vmatpush3.msra.mxu0 %v1292_v58  ;;  %v1318_v58 = vld [vmem:[#allocation7 + $0x450] sm:$0xff] }
 0x67d   :  { %3234 = vmatprep.subr.mxu0 %v1291_v61 }
 0x67e   :  { %3235 = vmatpush3.msra.mxu0 %v1291_v61  ;;  %v1316_v61 = vld [vmem:[#allocation7 + $0x440] sm:$0xff] }
 0x67f   :  { %3236 = vmatprep.subr.mxu0 %v1290_v62 }
 0x680   :  { %3237 = vmatpush3.msra.mxu0 %v1290_v62  ;;  %v1314_v62 = vld [vmem:[#allocation7 + $0x430] sm:$0xff] }
 0x681   :  { %3238 = vmatprep.subr.mxu0 %v1289_v0 }
 0x682   :  { %3239 = vmatpush3.msra.mxu0 %v1289_v0  ;;  %v1312_v0 = vld [vmem:[#allocation7 + $0x420] sm:$0xff] }
 0x683   :  { %3240 = vmatprep.subr.mxu0 %v1288_v2 }
 0x684   :  { %3241 = vmatpush3.msra.mxu0 %v1288_v2  ;;  %v1310_v2 = vld [vmem:[#allocation7 + $0x410] sm:$0xff] }
 0x685   :  { %3242 = vmatprep.subr.mxu0 %v1287_v5 }
 0x686   :  { %3243 = vmatpush3.msra.mxu0 %v1287_v5  ;;  %v2567_v5 = vld [vmem:[#allocation7 + $0x611] ss:$0 sm:$0xff] }
 0x687   :  { %3244 = vmatprep.subr.mxu0 %v1286_v7 }
 0x688   :  { %3245 = vmatpush3.msra.mxu0 %v1286_v7 }
 0x689   :  { %3246 = vmatprep.subr.mxu0 %v1285_v9 }
 0x68a   :  { %3247 = vmatpush3.msra.mxu0 %v1285_v9 }
 0x68b   :  { %3248 = vmatprep.subr.mxu0 %v1284_v11 }
 0x68c   :  { %3249 = vmatpush3.msra.mxu0 %v1284_v11 }
 0x68d   :  { %3250 = vmatprep.subr.mxu0 %v1283_v13 }
 0x68e   :  { %3251 = vmatpush3.msra.mxu0 %v1283_v13  ;;  %v3605_v13 = vld [vmem:[%s4064_s2 + $0x10] sm:$0xff] }
 0x68f   :  { %3252 = vmatprep.subr.mxu0 %v1282_v15 }
 0x690   :  { %3253 = vmatpush3.msra.mxu0 %v1282_v15  ;;  %v3607_v15 = vld [vmem:[%s4064_s2 + $0x20] sm:$0xff] }
 0x691   :  { %3254 = vmatprep.subr.mxu0 %v1281_v17 }
 0x692   :  { %3255 = vmatpush3.msra.mxu0 %v1281_v17  ;;  %v3608_v17 = vld [vmem:[%s4064_s2 + $0x28] sm:$0xff] }
 0x693   :  { %3256 = vmatprep.subr.mxu0 %v1280_v19 }
 0x694   :  { %3257 = vmatpush3.msra.mxu0 %v1280_v19 }
 0x695   :  { %3258 = vmatprep.subr.mxu0 %v1279_v21 }
 0x696   :  { %3259 = vmatpush3.msra.mxu0 %v1279_v21  ;;  %v2568_v21 = vld [vmem:[#allocation7 + $0x612] ss:$0 sm:$0xff] }
 0x697   :  { %3260 = vmatprep.subr.mxu0 %v1278_v23 }
 0x698   :  { %3261 = vmatpush3.msra.mxu0 %v1278_v23 }
 0x699   :  { %3300 = vmatprep.subr.mxu0 %v1325_v25 }
 0x739   :  { %v3194_v43 = vpop.f32.mrf.mxu0 }
 0x73a   :  { %v1153_v44 = vadd.f32 %v3194_v43, %v2562_v42 }
 0x73b   :  { %v1147_v45 = vpop.f32.mrf.mxu0 }
 0x73c   :  { %v1148_v46 = vadd.f32 %v2562_v42, %v1147_v45  ;;  %v1157_v48 = vmax.f32 %v1153_v44, 0.0  ;;  %v2564_v44 = vld [vmem:[#allocation7 + $0x308] ss:$0 sm:$0xff] }
 0x73e   :  { %v1156_v47 = vmax.f32 %v1148_v46, 0.0 }
 0x740   :  { %3227 = vmatprep.mubr.f32.mxu1 %v1156_v47 }
 0x741   :  { %3228 = vmatmul.mubr.f32.vlgmr.msra.gmra.mxu1 %v1157_v48 }
 0x742   :  { %3266 = vmatpush3.msra.mxu1 %v1309_v57  ;;  %v1319_v57 = vld [vmem:[#allocation7 + $0x458] sm:$0xff] }
 0x743   :  { %3267 = vmatprep.subr.mxu1 %v1308_v59 }
 0x744   :  { %3268 = vmatpush3.msra.mxu1 %v1308_v59  ;;  %v1317_v59 = vld [vmem:[#allocation7 + $0x448] sm:$0xff] }
 0x745   :  { %3269 = vmatprep.subr.mxu1 %v1307_v60 }
 0x746   :  { %3270 = vmatpush3.msra.mxu1 %v1307_v60  ;;  %v1315_v60 = vld [vmem:[#allocation7 + $0x438] sm:$0xff] }
 0x747   :  { %3271 = vmatprep.subr.mxu1 %v1306_v63 }
 0x748   :  { %3272 = vmatpush3.msra.mxu1 %v1306_v63  ;;  %v1313_v63 = vld [vmem:[#allocation7 + $0x428] sm:$0xff] }
 0x749   :  { %3273 = vmatprep.subr.mxu1 %v1305_v1 }
 0x74a   :  { %3274 = vmatpush3.msra.mxu1 %v1305_v1  ;;  %v1311_v1 = vld [vmem:[#allocation7 + $0x418] sm:$0xff] }
 0x74b   :  { %3275 = vmatprep.subr.mxu1 %v1304_v3 }
 0x74c   :  { %3276 = vmatpush3.msra.mxu1 %v1304_v3  ;;  %v2566_v3 = vld [vmem:[#allocation7 + $0x610] ss:$0 sm:$0xff] }
 0x74d   :  { %3277 = vmatprep.subr.mxu1 %v1303_v6 }
 0x74e   :  { %3278 = vmatpush3.msra.mxu1 %v1303_v6 }
 0x74f   :  { %3279 = vmatprep.subr.mxu1 %v1302_v8 }
 0x750   :  { %3280 = vmatpush3.msra.mxu1 %v1302_v8 }
 0x751   :  { %3281 = vmatprep.subr.mxu1 %v1301_v10 }
 0x752   :  { %3282 = vmatpush3.msra.mxu1 %v1301_v10 }
 0x753   :  { %3283 = vmatprep.subr.mxu1 %v1300_v12 }
 0x754   :  { %3284 = vmatpush3.msra.mxu1 %v1300_v12  ;;  %v3604_v12 = vld [vmem:[%s4064_s2 + $0x8] sm:$0xff] }
 0x755   :  { %3285 = vmatprep.subr.mxu1 %v1299_v14 }
 0x756   :  { %3286 = vmatpush3.msra.mxu1 %v1299_v14  ;;  %v3606_v14 = vld [vmem:[%s4064_s2 + $0x18] sm:$0xff] }
 0x757   :  { %3287 = vmatprep.subr.mxu1 %v1298_v16 }
 0x758   :  { %3288 = vmatpush3.msra.mxu1 %v1298_v16 }
 0x759   :  { %3289 = vmatprep.subr.mxu1 %v1297_v18 }
 0x75a   :  { %3290 = vmatpush3.msra.mxu1 %v1297_v18  ;;  %v3609_v18 = vld [vmem:[%s4064_s2 + $0x30] sm:$0xff] }
 0x75b   :  { %3291 = vmatprep.subr.mxu1 %v1296_v20 }
 0x75c   :  { %3292 = vmatpush3.msra.mxu1 %v1296_v20  ;;  %v3610_v20 = vld [vmem:[%s4064_s2 + $0x38] sm:$0xff] }
 0x75d   :  { %3293 = vmatprep.subr.mxu1 %v1295_v22 }
 0x75e   :  { %3294 = vmatpush3.msra.mxu1 %v1295_v22 }
 0x75f   :  { %3295 = vmatprep.subr.mxu1 %v1294_v24 }
 0x760   :  { %3296 = vmatpush3.msra.mxu1 %v1294_v24 }
 0x801   :  { %v3229_v4 = vpop.f32.mrf.mxu1 }
 0x802   :  { %v1234_v49 = vadd.f32 %v3229_v4, %v2563_v30 }
 0x803   :  { %v1228_v50 = vpop.f32.mrf.mxu1 }
 0x804   :  { %v3927_v51 = vadd.f32 %v1234_v49, %v1076_v37  ;;  %v1229_v52 = vadd.f32 %v2563_v30, %v1228_v50  ;;  %v2565_v30 = vld [vmem:[#allocation7 + $0x309] ss:$0 sm:$0xff] }
 0x806   :  { %v3929_v53 = vadd.f32 %v1229_v52, %v1075_v36  ;;  %1241 = vadd.xlane.f32.xlu1 %v3927_v51  ;;  %v1246_v54 = vmul.f32 %v3927_v51, %v3927_v51  ;;  %v1324_v52 = vld [vmem:[#allocation7 + $0x480] sm:$0xff] }
 0x808   :  { %1239 = vadd.xlane.f32.xlu0 %v3929_v53  ;;  %v1245_v55 = vmul.f32 %v3929_v53, %v3929_v53 }
 0x80a   :  { %1249 = vadd.xlane.f32.xlu1 %v1246_v54  ;;  %v1322_v54 = vld [vmem:[#allocation7 + $0x470] sm:$0xff] }
 0x80c   :  { %1247 = vadd.xlane.f32.xlu0 %v1245_v55  ;;  %v1321_v55 = vld [vmem:[#allocation7 + $0x468] sm:$0xff] }
 0x88f   :  { %v1242_v26 = vpop.xlane.xlu1 %1241 }
 0x890   :  { %v1244_v27 = vmul.f32 0.03125, %v1242_v26  ;;  %v3611_v26 = vld [vmem:[#allocation5 + $0x38] sm:$0xff] }
 0x891   :  { %v1240_v28 = vpop.xlane.xlu0 %1239 }
 0x892   :  { %v1243_v29 = vmul.f32 0.03125, %v1240_v28  ;;  %v1254_v32 = vmul.f32 %v1244_v27, %v1244_v27  ;;  %v1258_v41 = vsub.f32 %v3927_v51, %v1244_v27  ;;  %v1323_v51 = vld [vmem:[#allocation7 + $0x478] sm:$0xff]  ;;  %v3612_v27 = vld [vmem:[#allocation5 + $0x30] sm:$0xff]  ;;  %v3613_v28 = vld [vmem:[#allocation5 + $0x28] sm:$0xff] }
 0x893   :  { %v1250_v31 = vpop.xlane.xlu1 %1249 }
 0x894   :  { %v1252_v33 = vmul.f32 0.03125, %v1250_v31  ;;  %v1253_v35 = vmul.f32 %v1243_v29, %v1243_v29  ;;  %v1257_v43 = vsub.f32 %v3929_v53, %v1243_v29  ;;  %v3603_v53 = vld [vmem:[%s4064_s2] sm:$0xff]  ;;  %v3614_v29 = vld [vmem:[#allocation5 + $0x20] sm:$0xff]  ;;  %v3615_v31 = vld [vmem:[#allocation5 + $0x18] sm:$0xff] }
 0x895   :  { %v1248_v34 = vpop.xlane.xlu0 %1247 }
 0x896   :  { %v1256_v36 = vsub.f32 %v1252_v33, %v1254_v32  ;;  %v1251_v37 = vmul.f32 0.03125, %v1248_v34  ;;  %v3616_v32 = vld [vmem:[#allocation5 + $0x10] sm:$0xff]  ;;  %v3617_v33 = vld [vmem:[#allocation5 + $0x8] sm:$0xff]  ;;  %v3618_v34 = vld [vmem:[#allocation5] sm:$0xff] }
 0x898   :  { %v1260_v38 = vadd.f32 1e-05, %v1256_v36  ;;  %v1255_v39 = vsub.f32 %v1251_v37, %v1253_v35 }
 0x89a   :  { %3583 = vrsqrt.f32 %v1260_v38  ;;  %v1259_v40 = vadd.f32 1e-05, %v1255_v39 }
 0x89c   :  { %3585 = vrsqrt.f32 %v1259_v40 }
 0x8a7   :  { %v3584_v42 = vpop.eup %3583 }
 0x8a8   :  { %v1264_v45 = vmul.f32 %v3584_v42, %v1258_v41  ;;  %v3619_v42 = vld [vmem:[%s4065_s3 + $0x38] sm:$0xff] }
 0x8a9   :  { %v3586_v46 = vpop.eup %3585 }
 0x8aa   :  { %v1263_v47 = vmul.f32 %v3586_v46, %v1257_v43  ;;  %v1270_v48 = vmul.f32 %v2564_v44, %v1264_v45  ;;  %v3620_v45 = vld [vmem:[%s4065_s3 + $0x30] sm:$0xff] }
 0x8ac   :  { %v1269_v4 = vmul.f32 %v2564_v44, %v1263_v47  ;;  %v3941_v50 = vadd.f32 %v2565_v30, %v1270_v48  ;;  %v3621_v47 = vld [vmem:[%s4065_s3 + $0x28] sm:$0xff] }
 0x8ae   :  { %v3939_v49 = vadd.f32 %v2565_v30, %v1269_v4  ;;  %v3622_v30 = vld [vmem:[%s4065_s3 + $0x20] sm:$0xff] }
 0x8b0   :  { %3262 = vmatprep.mubr.f32.mxu0 %v3939_v49  ;;  %3297 = vmatprep.mubr.f32.mxu1 %v3939_v49 }
 0x8b1   :  { %3263 = vmatmul.mubr.f32.vlgmr.msra.gmra.mxu0 %v3941_v50  ;;  %3298 = vmatmul.mubr.f32.vlgmr.msra.gmra.mxu1 %v3941_v50 }
 0x8b2   :  { %3301 = vmatpush3.msra.mxu0 %v1325_v25  ;;  %3332 = vmatprep.mubr.f32.mxu0 %v3939_v49 }
 0x8b3   :  { %3302 = vmatprep.subr.mxu0 %v1324_v52  ;;  %3339 = vmatprep.mubr.msk.f32.mxu1 %vm453_vm0, %v3603_v53 }
 0x8b4   :  { %3303 = vmatpush3.msra.mxu0 %v1324_v52  ;;  %v3623_v52 = vld [vmem:[%s4065_s3 + $0x18] sm:$0xff] }
 0x8b5   :  { %3304 = vmatprep.subr.mxu0 %v1323_v51 }
 0x8b6   :  { %3305 = vmatpush3.msra.mxu0 %v1323_v51 }
 0x8b7   :  { %3306 = vmatprep.subr.mxu0 %v1322_v54 }
 0x8b8   :  { %3307 = vmatpush3.msra.mxu0 %v1322_v54 }
 0x8b9   :  { %3308 = vmatprep.subr.mxu0 %v1321_v55 }
 0x8ba   :  { %3309 = vmatpush3.msra.mxu0 %v1321_v55  ;;  %v3625_v55 = vld [vmem:[%s4065_s3 + $0x8] sm:$0xff] }
 0x8bb   :  { %3310 = vmatprep.subr.mxu0 %v1320_v56 }
 0x8bc   :  { %3311 = vmatpush3.msra.mxu0 %v1320_v56 }
 0x8bd   :  { %3312 = vmatprep.subr.mxu0 %v1319_v57 }
 0x8be   :  { %3313 = vmatpush3.msra.mxu0 %v1319_v57  ;;  %v3626_v57 = vld [vmem:[%s4065_s3] sm:$0xff] }
 0x8bf   :  { %3314 = vmatprep.subr.mxu0 %v1318_v58 }
 0x8c0   :  { %3315 = vmatpush3.msra.mxu0 %v1318_v58 }
 0x8c1   :  { %3316 = vmatprep.subr.mxu0 %v1317_v59 }
 0x8c2   :  { %3317 = vmatpush3.msra.mxu0 %v1317_v59 }
 0x8c3   :  { %3318 = vmatprep.subr.mxu0 %v1316_v61 }
 0x8c4   :  { %3319 = vmatpush3.msra.mxu0 %v1316_v61  ;;  %v3627_v61 = vld [vmem:[#allocation2 + $0x8] sm:$0xff] }
 0x8c5   :  { %3320 = vmatprep.subr.mxu0 %v1315_v60 }
 0x8c6   :  { %3321 = vmatpush3.msra.mxu0 %v1315_v60 }
 0x8c7   :  { %3322 = vmatprep.subr.mxu0 %v1314_v62 }
 0x8c8   :  { %3323 = vmatpush3.msra.mxu0 %v1314_v62 }
 0x8c9   :  { %3324 = vmatprep.subr.mxu0 %v1313_v63 }
 0x8ca   :  { %3325 = vmatpush3.msra.mxu0 %v1313_v63  ;;  %v3628_v63 = vld [vmem:[#allocation2] sm:$0xff] }
 0x8cb   :  { %3326 = vmatprep.subr.mxu0 %v1312_v0 }
 0x8cc   :  { %3327 = vmatpush3.msra.mxu0 %v1312_v0 }
 0x8cd   :  { %3328 = vmatprep.subr.mxu0 %v1311_v1 }
 0x8ce   :  { %3329 = vmatpush3.msra.mxu0 %v1311_v1 }
 0x8cf   :  { %3330 = vmatprep.subr.mxu0 %v1310_v2 }
 0x8d0   :  { %3331 = vmatpush3.msra.mxu0 %v1310_v2 }
 0x8d1   :  { %3333 = vmatmul.mubr.f32.vlgmr.msra.gmra.mxu0 %v3941_v50 }
 0x8d2   :  { %3355 = vmatprep.mubr.msk.f32.mxu0 %vm453_vm0, %v3603_v53  ;;  %v3624_v53 = vld [vmem:[%s4065_s3 + $0x10] sm:$0xff]  ;;  %s3743_s3 = smov [#allocation10]  }
 0x8d3   :  { %s2522_s12 = sshll.u32 %s3743_s3, 4  ;;  %s2523_s12 = int_to_ptr.vmem [resolvable:$true] %s2522_s12 }
 0x8d4   :  { %s3709_s13 = scalar_lea.vmem %s2523_s12, 256  ;;  %p3714_p7 = scmp.lt.s32.totalorder %s2523_s12, %s2523_s12 }
 0x8d5   :  { %p3710_p6 = scmp.ne.s32.totalorder %s2523_s12, %s3709_s13  ;;  %p3715_p8 = scmp.lt.s32.totalorder %s3709_s13, %s3709_s13 }
 0x8d7   :  { %p3716_p9 = por %p3715_p8, %p3714_p7 }
 0x8d9   :  { %p3717_p10 = pnand %p3716_p9, %p3710_p6 }
 0x971   :  { %v3264_v6 = vpop.f32.mrf.mxu0  ;;  %v3299_v7 = vpop.f32.mrf.mxu1 }
 0x972   :  { %v3954_v8 = vadd.f32 %v3264_v6, %v2566_v3  ;;  %v1539_v9 = vadd.f32 %v3299_v7, %v2567_v5 }
 0x973   :  { %v1533_v10 = vpop.f32.mrf.mxu1  ;;  %v1454_v16 = vpop.f32.mrf.mxu0 }
 0x974   :  { %v1534_v11 = vadd.f32 %v2567_v5, %v1533_v10  ;;  %3335 = vmatprep.subr.mxu1 %v1539_v9  ;;  %v1455_v19 = vadd.f32 %v2566_v3, %v1454_v16 }
 0x975   :  { %3336 = vmatpush3.msra.mxu1 %v1539_v9 }
 0x976   :  { %3337 = vmatprep.subr.mxu1 %v1534_v11 }
 0x977   :  { %3338 = vmatpush3.msra.mxu1 %v1534_v11 }
 0x978   :  { %3340 = vmatmul.mubr.msk.f32.vlgmr.msra.gmra.mxu1 %vm453_vm0, %v3604_v12 }
 0x979   :  { %3342 = vmatprep.mubr.msk.f32.mxu1 %vm453_vm0, %v3605_v13 }
 0x97c   :  { %3343 = vmatmul.mubr.msk.f32.gmra.mxu1 %vm453_vm0, %v3606_v14 }
 0x97d   :  { %3345 = vmatprep.mubr.msk.f32.mxu1 %vm453_vm0, %v3607_v15 }
 0x980   :  { %3346 = vmatmul.mubr.msk.f32.gmra.mxu1 %vm453_vm0, %v3608_v17 }
 0x981   :  { %3348 = vmatprep.mubr.msk.f32.mxu1 %vm453_vm0, %v3609_v18 }
 0x984   :  { %3349 = vmatmul.mubr.msk.f32.gmra.mxu1 %vm453_vm0, %v3610_v20 }
 0x985   :  { %3383 = vmatprep.mubr.f32.mxu1 %v1455_v19 }
 0x991   :  { %v3334_v22 = vpop.f32.mrf.mxu0 }
 0x992   :  { %v1618_v23 = vadd.f32 %v3334_v22, %v2568_v21 }
 0x993   :  { %v1612_v24 = vpop.f32.mrf.mxu0 }
 0x994   :  { %v1613_v25 = vadd.f32 %v2568_v21, %v1612_v24  ;;  %3351 = vmatprep.subr.mxu0 %v1618_v23 }
 0x995   :  { %3352 = vmatpush3.msra.mxu0 %v1618_v23 }
 0x996   :  { %3353 = vmatprep.subr.mxu0 %v1613_v25 }
 0x997   :  { %3354 = vmatpush3.msra.mxu0 %v1613_v25 }
 0x998   :  { %3356 = vmatmul.mubr.msk.f32.vlgmr.msra.gmra.mxu0 %vm453_vm0, %v3604_v12  ;;  %3386 = vmatprep.subr.mxu0 %v3611_v26 }
 0x999   :  { %3358 = vmatprep.mubr.msk.f32.mxu0 %vm453_vm0, %v3605_v13  ;;  %3387 = vmatpush3.msra.mxu0 %v3611_v26 }
 0x99a   :  { %3388 = vmatprep.subr.mxu0 %v3612_v27 }
 0x99b   :  { %3389 = vmatpush3.msra.mxu0 %v3612_v27 }
 0x99c   :  { %3359 = vmatmul.mubr.msk.f32.gmra.mxu0 %vm453_vm0, %v3606_v14  ;;  %3390 = vmatprep.subr.mxu0 %v3613_v28 }
 0x99d   :  { %3361 = vmatprep.mubr.msk.f32.mxu0 %vm453_vm0, %v3607_v15  ;;  %3391 = vmatpush3.msra.mxu0 %v3613_v28  ;;  %v1341_v28 = vld [vmem:[#allocation7 + $0x508] sm:$0xff] }
 0x99e   :  { %3392 = vmatprep.subr.mxu0 %v3614_v29 }
 0x99f   :  { %3393 = vmatpush3.msra.mxu0 %v3614_v29  ;;  %v1340_v29 = vld [vmem:[#allocation7 + $0x500] sm:$0xff] }
 0x9a0   :  { %3362 = vmatmul.mubr.msk.f32.gmra.mxu0 %vm453_vm0, %v3608_v17  ;;  %3394 = vmatprep.subr.mxu0 %v3615_v31 }
 0x9a1   :  { %3364 = vmatprep.mubr.msk.f32.mxu0 %vm453_vm0, %v3609_v18  ;;  %3395 = vmatpush3.msra.mxu0 %v3615_v31  ;;  %v1339_v31 = vld [vmem:[#allocation7 + $0x4f8] sm:$0xff] }
 0x9a2   :  { %3396 = vmatprep.subr.mxu0 %v3616_v32 }
 0x9a3   :  { %3397 = vmatpush3.msra.mxu0 %v3616_v32  ;;  %v1338_v32 = vld [vmem:[#allocation7 + $0x4f0] sm:$0xff] }
 0x9a4   :  { %3365 = vmatmul.mubr.msk.f32.gmra.mxu0 %vm453_vm0, %v3610_v20  ;;  %3398 = vmatprep.subr.mxu0 %v3617_v33 }
 0x9a5   :  { %3399 = vmatpush3.msra.mxu0 %v3617_v33  ;;  %v1337_v33 = vld [vmem:[#allocation7 + $0x4e8] sm:$0xff] }
 0x9a6   :  { %3400 = vmatprep.subr.mxu0 %v3618_v34 }
 0x9a7   :  { %3401 = vmatpush3.msra.mxu0 %v3618_v34  ;;  %v1336_v34 = vld [vmem:[#allocation7 + $0x4e0] sm:$0xff] }
 0xa38   :  { %v3341_v35 = vpop.f32.mrf.mxu1 }
 0xa39   :  { %v1727_v56 = vmul.f32 %v3625_v55, %v3341_v35  ;;  %v1335_v35 = vld [vmem:[#allocation7 + $0x4d8] sm:$0xff] }
 0xa3a   :  { %v1687_v36 = vpop.f32.mrf.mxu1 }
 0xa3b   :  { %v1726_v58 = vmul.f32 %v3626_v57, %v1687_v36  ;;  %v1334_v36 = vld [vmem:[#allocation7 + $0x4d0] sm:$0xff] }
 0xa3c   :  { %v3344_v37 = vpop.f32.mrf.mxu1 }
 0xa3d   :  { %v1729_v51 = vmul.f32 %v3623_v52, %v3344_v37  ;;  %v1333_v37 = vld [vmem:[#allocation7 + $0x4c8] sm:$0xff] }
 0xa3e   :  { %v1697_v38 = vpop.f32.mrf.mxu1 }
 0xa3f   :  { %v1728_v54 = vmul.f32 %v3624_v53, %v1697_v38  ;;  %v1332_v38 = vld [vmem:[#allocation7 + $0x4c0] sm:$0xff] }
 0xa40   :  { %v3347_v39 = vpop.f32.mrf.mxu1 }
 0xa41   :  { %v1731_v48 = vmul.f32 %v3621_v47, %v3347_v39  ;;  %v1331_v39 = vld [vmem:[#allocation7 + $0x4b8] sm:$0xff] }
 0xa42   :  { %v1707_v40 = vpop.f32.mrf.mxu1 }
 0xa43   :  { %v1730_v4 = vmul.f32 %v3622_v30, %v1707_v40  ;;  %v1330_v40 = vld [vmem:[#allocation7 + $0x4b0] sm:$0xff] }
 0xa44   :  { %v3350_v41 = vpop.f32.mrf.mxu1 }
 0xa45   :  { %v1733_v43 = vmul.f32 %v3619_v42, %v3350_v41  ;;  %v1329_v41 = vld [vmem:[#allocation7 + $0x4a8] sm:$0xff] }
 0xa46   :  { %v1717_v44 = vpop.f32.mrf.mxu1 }
 0xa47   :  { %v1732_v46 = vmul.f32 %v3620_v45, %v1717_v44  ;;  %3367 = vmatprep.subr.mxu1 %v1733_v43 }
 0xa48   :  { %3368 = vmatpush3.xpose.msra.mxu1 %v1733_v43 }
 0xa49   :  { %3369 = vmatprep.subr.mxu1 %v1732_v46 }
 0xa4c   :  { %3370 = vmatpush3.xpose.msra.mxu1 %v1732_v46 }
 0xa4d   :  { %3371 = vmatprep.subr.mxu1 %v1731_v48 }
 0xa50   :  { %3372 = vmatpush3.xpose.msra.mxu1 %v1731_v48 }
 0xa51   :  { %3373 = vmatprep.subr.mxu1 %v1730_v4 }
 0xa54   :  { %3374 = vmatpush3.xpose.msra.mxu1 %v1730_v4 }
 0xa55   :  { %3375 = vmatprep.subr.mxu1 %v1729_v51 }
 0xa58   :  { %3376 = vmatpush3.xpose.msra.mxu1 %v1729_v51  ;;  %v3357_v3 = vpop.f32.mrf.mxu0  ;;  %v1326_v51 = vld [vmem:[#allocation7 + $0x490] sm:$0xff] }
 0xa59   :  { %3377 = vmatprep.subr.mxu1 %v1728_v54  ;;  %v1840_v26 = vmul.f32 %v3625_v55, %v3357_v3  ;;  %v2589_v55 = vld [vmem:[#allocation7 + $0x613] ss:$0 sm:$0xff]  ;;  %v1352_v3 = vld [vmem:[#allocation7 + $0x560] sm:$0xff] }
 0xa5a   :  { %v1800_v5 = vpop.f32.mrf.mxu0 }
 0xa5b   :  { %v1839_v27 = vmul.f32 %v3626_v57, %v1800_v5  ;;  %v1351_v5 = vld [vmem:[#allocation7 + $0x558] sm:$0xff] }
 0xa5c   :  { %3378 = vmatpush3.xpose.msra.mxu1 %v1728_v54  ;;  %v3360_v6 = vpop.f32.mrf.mxu0 }
 0xa5d   :  { %3379 = vmatprep.subr.mxu1 %v1727_v56  ;;  %v1842_v24 = vmul.f32 %v3623_v52, %v3360_v6  ;;  %v1327_v52 = vld [vmem:[#allocation7 + $0x498] sm:$0xff]  ;;  %v1350_v6 = vld [vmem:[#allocation7 + $0x550] sm:$0xff] }
 0xa5e   :  { %v1810_v7 = vpop.f32.mrf.mxu0 }
 0xa5f   :  { %v1841_v25 = vmul.f32 %v3624_v53, %v1810_v7  ;;  %v1349_v7 = vld [vmem:[#allocation7 + $0x548] sm:$0xff] }
 0xa60   :  { %3380 = vmatpush3.xpose.msra.mxu1 %v1727_v56  ;;  %v3363_v9 = vpop.f32.mrf.mxu0 }
 0xa61   :  { %3381 = vmatprep.subr.mxu1 %v1726_v58  ;;  %v1844_v22 = vmul.f32 %v3621_v47, %v3363_v9  ;;  %v1348_v9 = vld [vmem:[#allocation7 + $0x540] sm:$0xff] }
 0xa62   :  { %v1820_v10 = vpop.f32.mrf.mxu0 }
 0xa63   :  { %v1843_v23 = vmul.f32 %v3622_v30, %v1820_v10  ;;  %v1347_v10 = vld [vmem:[#allocation7 + $0x538] sm:$0xff] }
 0xa64   :  { %3382 = vmatpush3.xpose.msra.mxu1 %v1726_v58  ;;  %v3366_v11 = vpop.f32.mrf.mxu0 }
 0xa65   :  { %3424 = vmatprep.subr.mxu1 %v1341_v28 }
 0xa66   :  { %v1830_v18 = vpop.f32.mrf.mxu0 }
 0xa67   :  { %3384 = vmatmul.mubr.f32.vlgmr.msra.gmra.mxu1 %v3954_v8  ;;  %v1846_v8 = vmul.f32 %v3619_v42, %v3366_v11  ;;  %v1845_v20 = vmul.f32 %v3620_v45, %v1830_v18  ;;  %v1328_v42 = vld [vmem:[#allocation7 + $0x4a0] sm:$0xff]  ;;  %v1346_v11 = vld [vmem:[#allocation7 + $0x530] sm:$0xff] }
 0xa68   :  { %3425 = vmatpush3.msra.mxu1 %v1341_v28  ;;  %v1370_v18 = vld [vmem:[#allocation7 + $0x5f0] sm:$0xff] }
 0xa69   :  { %3405 = vmatprep.subr.mxu0 %v1846_v8  ;;  %3426 = vmatprep.subr.mxu1 %v1340_v29 }
 0xa6a   :  { %3427 = vmatpush3.msra.mxu1 %v1340_v29 }
 0xa6b   :  { %3428 = vmatprep.subr.mxu1 %v1339_v31 }
 0xa6c   :  { %3429 = vmatpush3.msra.mxu1 %v1339_v31 }
 0xa6d   :  { %3430 = vmatprep.subr.mxu1 %v1338_v32 }
 0xa6e   :  { %3431 = vmatpush3.msra.mxu1 %v1338_v32 }
 0xa6f   :  { %3432 = vmatprep.subr.mxu1 %v1337_v33 }
 0xa70   :  { %3433 = vmatpush3.msra.mxu1 %v1337_v33 }
 0xa71   :  { %3434 = vmatprep.subr.mxu1 %v1336_v34 }
 0xa72   :  { %3435 = vmatpush3.msra.mxu1 %v1336_v34 }
 0xa73   :  { %3436 = vmatprep.subr.mxu1 %v1335_v35 }
 0xa74   :  { %3437 = vmatpush3.msra.mxu1 %v1335_v35 }
 0xa75   :  { %3438 = vmatprep.subr.mxu1 %v1334_v36 }
 0xa76   :  { %3439 = vmatpush3.msra.mxu1 %v1334_v36 }
 0xa77   :  { %3440 = vmatprep.subr.mxu1 %v1333_v37 }
 0xa78   :  { %3441 = vmatpush3.msra.mxu1 %v1333_v37 }
 0xa79   :  { %3442 = vmatprep.subr.mxu1 %v1332_v38 }
 0xa7a   :  { %3443 = vmatpush3.msra.mxu1 %v1332_v38 }
 0xa7b   :  { %3444 = vmatprep.subr.mxu1 %v1331_v39 }
 0xa7c   :  { %3445 = vmatpush3.msra.mxu1 %v1331_v39 }
 0xa7d   :  { %3446 = vmatprep.subr.mxu1 %v1330_v40 }
 0xa7e   :  { %3447 = vmatpush3.msra.mxu1 %v1330_v40 }
 0xa7f   :  { %3448 = vmatprep.subr.mxu1 %v1329_v41 }
 0xa80   :  { %3449 = vmatpush3.msra.mxu1 %v1329_v41 }
 0xa81   :  { %3450 = vmatprep.subr.mxu1 %v1328_v42 }
 0xa82   :  { %3451 = vmatpush3.msra.mxu1 %v1328_v42 }
 0xa83   :  { %3452 = vmatprep.subr.mxu1 %v1327_v52 }
 0xa84   :  { %3453 = vmatpush3.msra.mxu1 %v1327_v52 }
 0xa85   :  { %3454 = vmatprep.subr.mxu1 %v1326_v51 }
 0xa86   :  { %3455 = vmatpush3.msra.mxu1 %v1326_v51 }
 0xb27   :  { %v3385_v59 = vpop.f32.mrf.mxu1 }
 0xb28   :  { %v1919_v60 = vadd.f32 %v3627_v61, %v3385_v59 }
 0xb29   :  { %v1913_v62 = vpop.f32.mrf.mxu1 }
 0xb2a   :  { %v1914_v0 = vadd.f32 %v3628_v63, %v1913_v62  ;;  %v1925_v1 = vsel %vm779_vm1, %v1919_v60, -inf }
 0xb2b   :  { %1926 = vmax.xlane.f32.xlu1 %v1925_v1  ;;  %v1354_v1 = vld [vmem:[#allocation7 + $0x570] sm:$0xff] }
 0xb2c   :  { %v1922_v2 = vsel %vm779_vm1, %v1914_v0, -inf }
 0xb2d   :  { %1923 = vmax.xlane.f32.xlu0 %v1922_v2  ;;  %v1353_v2 = vld [vmem:[#allocation7 + $0x568] sm:$0xff] }
 0xbb4   :  { %v1927_v12 = vpop.xlane.xlu1 %1926 }
 0xbb5   :  { %v1929_v13 = vsub.f32 %v1919_v60, %v1927_v12  ;;  %v1344_v12 = vld [vmem:[#allocation7 + $0x520] sm:$0xff] }
 0xbb6   :  { %v1924_v14 = vpop.xlane.xlu0 %1923 }
 0xbb7   :  { %v1928_v15 = vsub.f32 %v1914_v0, %v1924_v14  ;;  %v1932_v16 = vmul.f32 1.442695, %v1929_v13  ;;  %v1357_v0 = vld [vmem:[#allocation7 + $0x588] sm:$0xff]  ;;  %v1343_v13 = vld [vmem:[#allocation7 + $0x518] sm:$0xff]  ;;  %v1342_v14 = vld [vmem:[#allocation7 + $0x510] sm:$0xff] }
 0xbb9   :  { %v1930_v17 = vmul.f32 1.442695, %v1928_v15  ;;  %v1373_v15 = vld [vmem:[#allocation7 + $0x608] sm:$0xff] }
 0xbba   :  { %3494 = vmatprep.subr.mxu1 %v1373_v15 }
 0xbbb   :  { %3587 = vpow2.f32 %v1930_v17  ;;  %v1371_v17 = vld [vmem:[#allocation7 + $0x5f8] sm:$0xff] }
 0xbbc   :  { %3589 = vpow2.f32 %v1932_v16  ;;  %v1372_v16 = vld [vmem:[#allocation7 + $0x600] sm:$0xff] }
 0xbc8   :  { %v4018_v19 = vpop.eup %3587 }
 0xbc9   :  { %v4020_v21 = vpop.eup %3589  ;;  %3402 = vmatprep.mubr.msk.f32.mxu0 %vm779_vm1, %v4018_v19 }
 0xbca   :  { %3403 = vmatmul.mubr.msk.f32.vlgmr.msra.gmra.mxu0 %vm779_vm1, %v4020_v21 }
 0xbcb   :  { %3406 = vmatpush3.msra.mxu0 %v1846_v8  ;;  %v1345_v8 = vld [vmem:[#allocation7 + $0x528] sm:$0xff] }
 0xbcc   :  { %3407 = vmatprep.subr.mxu0 %v1845_v20 }
 0xbcd   :  { %3408 = vmatpush3.msra.mxu0 %v1845_v20  ;;  %v1368_v20 = vld [vmem:[#allocation7 + $0x5e0] sm:$0xff] }
 0xbce   :  { %3409 = vmatprep.subr.mxu0 %v1844_v22 }
 0xbcf   :  { %3410 = vmatpush3.msra.mxu0 %v1844_v22  ;;  %v1366_v22 = vld [vmem:[#allocation7 + $0x5d0] sm:$0xff] }
 0xbd0   :  { %3411 = vmatprep.subr.mxu0 %v1843_v23 }
 0xbd1   :  { %3412 = vmatpush3.msra.mxu0 %v1843_v23  ;;  %v1365_v23 = vld [vmem:[#allocation7 + $0x5c8] sm:$0xff] }
 0xbd2   :  { %3413 = vmatprep.subr.mxu0 %v1842_v24 }
 0xbd3   :  { %3414 = vmatpush3.msra.mxu0 %v1842_v24  ;;  %v1364_v24 = vld [vmem:[#allocation7 + $0x5c0] sm:$0xff] }
 0xbd4   :  { %3415 = vmatprep.subr.mxu0 %v1841_v25 }
 0xbd5   :  { %3416 = vmatpush3.msra.mxu0 %v1841_v25  ;;  %v1363_v25 = vld [vmem:[#allocation7 + $0x5b8] sm:$0xff] }
 0xbd6   :  { %3417 = vmatprep.subr.mxu0 %v1840_v26 }
 0xbd7   :  { %3418 = vmatpush3.msra.mxu0 %v1840_v26  ;;  %v1362_v26 = vld [vmem:[#allocation7 + $0x5b0] sm:$0xff] }
 0xbd8   :  { %3419 = vmatprep.subr.mxu0 %v1839_v27 }
 0xbd9   :  { %3420 = vmatpush3.msra.mxu0 %v1839_v27 }
 0xbda   :  { %3459 = vmatprep.subr.mxu0 %v1357_v0 }
 0xc8a   :  { %v3404_v43 = vpop.f32.mrf.mxu0 }
 0xc8b   :  { %v2012_v44 = vadd.f32 1e-09, %v3404_v43 }
 0xc8c   :  { %v2006_v45 = vpop.f32.mrf.mxu0 }
 0xc8d   :  { %v2007_v46 = vadd.f32 1e-09, %v2006_v45  ;;  %3591 = vrcp.f32 %v2012_v44  ;;  %v2590_v45 = vld [vmem:[#allocation7 + $0x616] ss:$0 sm:$0xff] }
 0xc8f   :  { %3593 = vrcp.f32 %v2007_v46 }
 0xc9a   :  { %v3592_v47 = vpop.eup %3591 }
 0xc9b   :  { %v2018_v4 = vmul.f32 %v3592_v47, %v4020_v21  ;;  %v1367_v21 = vld [vmem:[#allocation7 + $0x5d8] sm:$0xff] }
 0xc9c   :  { %v3594_v48 = vpop.eup %3593 }
 0xc9d   :  { %v2017_v30 = vmul.f32 %v3594_v48, %v4018_v19  ;;  %v1369_v19 = vld [vmem:[#allocation7 + $0x5e8] sm:$0xff] }
 0xc9f   :  { %3421 = vmatprep.mubr.msk.f32.mxu0 %vm779_vm1, %v2017_v30 }
 0xca0   :  { %3422 = vmatmul.mubr.msk.f32.vlgmr.msra.gmra.mxu0 %vm779_vm1, %v2018_v4  ;;  %v2591_v4 = vld [vmem:[#allocation7 + $0x617] ss:$0 sm:$0xff] }
 0xca1   :  { %3460 = vmatpush3.msra.mxu0 %v1357_v0 }
 0xd60   :  { %v3423_v53 = vpop.f32.mrf.mxu0 }
 0xd62   :  { %v2091_v54 = vpop.f32.mrf.mxu0 }
 0xd63   :  { %3456 = vmatprep.mubr.f32.mxu1 %v2091_v54  ;;  %v1361_v54 = vld [vmem:[#allocation7 + $0x5a8] sm:$0xff] }
 0xd64   :  { %3457 = vmatmul.mubr.f32.vlgmr.msra.gmra.mxu1 %v3423_v53 }
 0xd65   :  { %3495 = vmatpush3.msra.mxu1 %v1373_v15  ;;  %v2428_v15 = vld [vmem:[#allocation8 + $0x48] sm:$0xff] }
 0xd66   :  { %3496 = vmatprep.subr.mxu1 %v1372_v16 }
 0xd67   :  { %3497 = vmatpush3.msra.mxu1 %v1372_v16  ;;  %v2427_v16 = vld [vmem:[#allocation8 + $0x40] sm:$0xff] }
 0xd68   :  { %3498 = vmatprep.subr.mxu1 %v1371_v17 }
 0xd69   :  { %3499 = vmatpush3.msra.mxu1 %v1371_v17  ;;  %v2426_v17 = vld [vmem:[#allocation8 + $0x38] sm:$0xff] }
 0xd6a   :  { %3500 = vmatprep.subr.mxu1 %v1370_v18 }
 0xd6b   :  { %3501 = vmatpush3.msra.mxu1 %v1370_v18  ;;  %v2425_v18 = vld [vmem:[#allocation8 + $0x30] sm:$0xff] }
 0xd6c   :  { %3502 = vmatprep.subr.mxu1 %v1369_v19 }
 0xd6d   :  { %3503 = vmatpush3.msra.mxu1 %v1369_v19  ;;  %v2424_v19 = vld [vmem:[#allocation8 + $0x28] sm:$0xff] }
 0xd6e   :  { %3504 = vmatprep.subr.mxu1 %v1368_v20 }
 0xd6f   :  { %3505 = vmatpush3.msra.mxu1 %v1368_v20  ;;  %v2423_v20 = vld [vmem:[#allocation8 + $0x20] sm:$0xff] }
 0xd70   :  { %3506 = vmatprep.subr.mxu1 %v1367_v21 }
 0xd71   :  { %3507 = vmatpush3.msra.mxu1 %v1367_v21  ;;  %v2422_v21 = vld [vmem:[#allocation8 + $0x18] sm:$0xff] }
 0xd72   :  { %3508 = vmatprep.subr.mxu1 %v1366_v22 }
 0xd73   :  { %3509 = vmatpush3.msra.mxu1 %v1366_v22  ;;  %v2421_v22 = vld [vmem:[#allocation8 + $0x10] sm:$0xff] }
 0xd74   :  { %3510 = vmatprep.subr.mxu1 %v1365_v23 }
 0xd75   :  { %3511 = vmatpush3.msra.mxu1 %v1365_v23  ;;  %v2420_v23 = vld [vmem:[#allocation8 + $0x8] sm:$0xff] }
 0xd76   :  { %3512 = vmatprep.subr.mxu1 %v1364_v24 }
 0xd77   :  { %3513 = vmatpush3.msra.mxu1 %v1364_v24  ;;  %v2419_v24 = vld [vmem:[#allocation8] sm:$0xff] }
 0xd78   :  { %3514 = vmatprep.subr.mxu1 %v1363_v25 }
 0xd79   :  { %3515 = vmatpush3.msra.mxu1 %v1363_v25 }
 0xd7a   :  { %3516 = vmatprep.subr.mxu1 %v1362_v26 }
 0xd7b   :  { %3517 = vmatpush3.msra.mxu1 %v1362_v26 }
 0xd7c   :  { %3518 = vmatprep.subr.mxu1 %v1361_v54 }
 0xd7d   :  { %3519 = vmatpush3.msra.mxu1 %v1361_v54 }
 0xe24   :  { %v3458_v56 = vpop.f32.mrf.mxu1 }
 0xe25   :  { %v2176_v57 = vadd.f32 %v3458_v56, %v2589_v55  ;;  %v1359_v56 = vld [vmem:[#allocation7 + $0x598] sm:$0xff] }
 0xe26   :  { %v2170_v58 = vpop.f32.mrf.mxu1 }
 0xe27   :  { %v4031_v59 = vadd.f32 %v2176_v57, %v3941_v50  ;;  %v2171_v61 = vadd.f32 %v2589_v55, %v2170_v58  ;;  %v1356_v50 = vld [vmem:[#allocation7 + $0x580] sm:$0xff]  ;;  %v1358_v57 = vld [vmem:[#allocation7 + $0x590] sm:$0xff] }
 0xe28   :  { %3461 = vmatprep.subr.mxu0 %v1356_v50  ;;  %v1360_v55 = vld [vmem:[#allocation7 + $0x5a0] sm:$0xff]  ;;  %v2592_v58 = vld [vmem:[#allocation7 + $0x614] ss:$0 sm:$0xff] }
 0xe29   :  { %v4034_v60 = vadd.f32 %v2171_v61, %v3939_v49  ;;  %2183 = vadd.xlane.f32.xlu1 %v4031_v59  ;;  %v2188_v62 = vmul.f32 %v4031_v59, %v4031_v59  ;;  %3462 = vmatpush3.msra.mxu0 %v1356_v50  ;;  %v1355_v49 = vld [vmem:[#allocation7 + $0x578] sm:$0xff]  ;;  %v2593_v50 = vld [vmem:[#allocation7 + $0x615] ss:$0 sm:$0xff] }
 0xe2a   :  { %3463 = vmatprep.subr.mxu0 %v1355_v49  ;;  %3520 = vmatprep.subr.mxu1 %v1360_v55 }
 0xe2b   :  { %2181 = vadd.xlane.f32.xlu0 %v4034_v60  ;;  %v2187_v63 = vmul.f32 %v4034_v60, %v4034_v60  ;;  %3464 = vmatpush3.msra.mxu0 %v1355_v49 }
 0xe2c   :  { %3465 = vmatprep.subr.mxu0 %v1354_v1  ;;  %3521 = vmatpush3.msra.mxu1 %v1360_v55 }
 0xe2d   :  { %2191 = vadd.xlane.f32.xlu1 %v2188_v62  ;;  %3466 = vmatpush3.msra.mxu0 %v1354_v1 }
 0xe2e   :  { %3467 = vmatprep.subr.mxu0 %v1353_v2  ;;  %3522 = vmatprep.subr.mxu1 %v1359_v56 }
 0xe2f   :  { %2189 = vadd.xlane.f32.xlu0 %v2187_v63  ;;  %3468 = vmatpush3.msra.mxu0 %v1353_v2 }
 0xe30   :  { %3469 = vmatprep.subr.mxu0 %v1352_v3  ;;  %3523 = vmatpush3.msra.mxu1 %v1359_v56 }
 0xe31   :  { %3470 = vmatpush3.msra.mxu0 %v1352_v3  ;;  %3524 = vmatprep.subr.mxu1 %v1358_v57 }
 0xe32   :  { %3471 = vmatprep.subr.mxu0 %v1351_v5  ;;  %3525 = vmatpush3.msra.mxu1 %v1358_v57 }
 0xe33   :  { %3472 = vmatpush3.msra.mxu0 %v1351_v5 }
 0xe34   :  { %3473 = vmatprep.subr.mxu0 %v1350_v6 }
 0xe35   :  { %3474 = vmatpush3.msra.mxu0 %v1350_v6 }
 0xe36   :  { %3475 = vmatprep.subr.mxu0 %v1349_v7 }
 0xe37   :  { %3476 = vmatpush3.msra.mxu0 %v1349_v7 }
 0xe38   :  { %3477 = vmatprep.subr.mxu0 %v1348_v9 }
 0xe39   :  { %3478 = vmatpush3.msra.mxu0 %v1348_v9 }
 0xe3a   :  { %3479 = vmatprep.subr.mxu0 %v1347_v10 }
 0xe3b   :  { %3480 = vmatpush3.msra.mxu0 %v1347_v10  ;;  %v2434_v10 = vld [vmem:[#allocation8 + $0x78] sm:$0xff] }
 0xe3c   :  { %3481 = vmatprep.subr.mxu0 %v1346_v11 }
 0xe3d   :  { %3482 = vmatpush3.msra.mxu0 %v1346_v11  ;;  %v2433_v11 = vld [vmem:[#allocation8 + $0x70] sm:$0xff] }
 0xe3e   :  { %3483 = vmatprep.subr.mxu0 %v1345_v8 }
 0xe3f   :  { %3484 = vmatpush3.msra.mxu0 %v1345_v8  ;;  %v2432_v8 = vld [vmem:[#allocation8 + $0x68] sm:$0xff] }
 0xe40   :  { %3485 = vmatprep.subr.mxu0 %v1344_v12 }
 0xe41   :  { %3486 = vmatpush3.msra.mxu0 %v1344_v12  ;;  %v2431_v12 = vld [vmem:[#allocation8 + $0x60] sm:$0xff] }
 0xe42   :  { %3487 = vmatprep.subr.mxu0 %v1343_v13 }
 0xe43   :  { %3488 = vmatpush3.msra.mxu0 %v1343_v13  ;;  %v2430_v13 = vld [vmem:[#allocation8 + $0x58] sm:$0xff] }
 0xe44   :  { %3489 = vmatprep.subr.mxu0 %v1342_v14 }
 0xe45   :  { %3490 = vmatpush3.msra.mxu0 %v1342_v14  ;;  %v2429_v14 = vld [vmem:[#allocation8 + $0x50] sm:$0xff] }
 0xe46   :  { %3529 = vmatprep.subr.mxu0 %v2434_v10 }
 0xeb2   :  { %v2184_v27 = vpop.xlane.xlu1 %2183 }
 0xeb3   :  { %v2186_v28 = vmul.f32 0.03125, %v2184_v27 }
 0xeb4   :  { %v2182_v29 = vpop.xlane.xlu0 %2181 }
 0xeb5   :  { %v2185_v31 = vmul.f32 0.03125, %v2182_v29  ;;  %v2196_v33 = vmul.f32 %v2186_v28, %v2186_v28  ;;  %v2200_v42 = vsub.f32 %v4031_v59, %v2186_v28 }
 0xeb6   :  { %v2192_v32 = vpop.xlane.xlu1 %2191 }
 0xeb7   :  { %v2194_v34 = vmul.f32 0.03125, %v2192_v32  ;;  %v2195_v36 = vmul.f32 %v2185_v31, %v2185_v31  ;;  %v2199_v44 = vsub.f32 %v4034_v60, %v2185_v31 }
 0xeb8   :  { %v2190_v35 = vpop.xlane.xlu0 %2189 }
 0xeb9   :  { %v2198_v37 = vsub.f32 %v2194_v34, %v2196_v33  ;;  %v2193_v38 = vmul.f32 0.03125, %v2190_v35 }
 0xebb   :  { %v2202_v39 = vadd.f32 1e-05, %v2198_v37  ;;  %v2197_v40 = vsub.f32 %v2193_v38, %v2195_v36 }
 0xebd   :  { %3595 = vrsqrt.f32 %v2202_v39  ;;  %v2201_v41 = vadd.f32 1e-05, %v2197_v40 }
 0xebf   :  { %3597 = vrsqrt.f32 %v2201_v41 }
 0xeca   :  { %v3596_v43 = vpop.eup %3595 }
 0xecb   :  { %v2206_v46 = vmul.f32 %v3596_v43, %v2200_v42  ;;  %v2594_v43 = vld [vmem:[#allocation7 + $0x618] ss:$0 sm:$0xff] }
 0xecc   :  { %v3598_v47 = vpop.eup %3597 }
 0xecd   :  { %v2205_v48 = vmul.f32 %v3598_v47, %v2199_v44  ;;  %v2212_v30 = vmul.f32 %v2590_v45, %v2206_v46 }
 0xecf   :  { %v2211_v52 = vmul.f32 %v2590_v45, %v2205_v48  ;;  %v2218_v53 = vadd.f32 %v2591_v4, %v2212_v30  ;;  %v2595_v48 = vld [vmem:[#allocation7 + $0x619] ss:$0 sm:$0xff] }
 0xed1   :  { %v2217_v51 = vadd.f32 %v2591_v4, %v2211_v52 }
 0xed3   :  { %3491 = vmatprep.mubr.f32.mxu0 %v2217_v51 }
 0xed4   :  { %3492 = vmatmul.mubr.f32.vlgmr.msra.gmra.mxu0 %v2218_v53 }
 0xed5   :  { %3530 = vmatpush3.msra.mxu0 %v2434_v10 }
 0xed6   :  { %3531 = vmatprep.subr.mxu0 %v2433_v11 }
 0xed7   :  { %3532 = vmatpush3.msra.mxu0 %v2433_v11 }
 0xed8   :  { %3533 = vmatprep.subr.mxu0 %v2432_v8 }
 0xed9   :  { %3534 = vmatpush3.msra.mxu0 %v2432_v8 }
 0xeda   :  { %3535 = vmatprep.subr.mxu0 %v2431_v12 }
 0xedb   :  { %3536 = vmatpush3.msra.mxu0 %v2431_v12 }
 0xedc   :  { %3537 = vmatprep.subr.mxu0 %v2430_v13 }
 0xedd   :  { %3538 = vmatpush3.msra.mxu0 %v2430_v13 }
 0xede   :  { %3539 = vmatprep.subr.mxu0 %v2429_v14 }
 0xedf   :  { %3540 = vmatpush3.msra.mxu0 %v2429_v14 }
 0xee0   :  { %3541 = vmatprep.subr.mxu0 %v2428_v15 }
 0xee1   :  { %3542 = vmatpush3.msra.mxu0 %v2428_v15 }
 0xee2   :  { %3543 = vmatprep.subr.mxu0 %v2427_v16 }
 0xee3   :  { %3544 = vmatpush3.msra.mxu0 %v2427_v16 }
 0xee4   :  { %3545 = vmatprep.subr.mxu0 %v2426_v17 }
 0xee5   :  { %3546 = vmatpush3.msra.mxu0 %v2426_v17 }
 0xee6   :  { %3547 = vmatprep.subr.mxu0 %v2425_v18 }
 0xee7   :  { %3548 = vmatpush3.msra.mxu0 %v2425_v18 }
 0xee8   :  { %3549 = vmatprep.subr.mxu0 %v2424_v19 }
 0xee9   :  { %3550 = vmatpush3.msra.mxu0 %v2424_v19 }
 0xeea   :  { %3551 = vmatprep.subr.mxu0 %v2423_v20 }
 0xeeb   :  { %3552 = vmatpush3.msra.mxu0 %v2423_v20 }
 0xeec   :  { %3553 = vmatprep.subr.mxu0 %v2422_v21 }
 0xeed   :  { %3554 = vmatpush3.msra.mxu0 %v2422_v21 }
 0xeee   :  { %3555 = vmatprep.subr.mxu0 %v2421_v22 }
 0xeef   :  { %3556 = vmatpush3.msra.mxu0 %v2421_v22 }
 0xef0   :  { %3557 = vmatprep.subr.mxu0 %v2420_v23 }
 0xef1   :  { %3558 = vmatpush3.msra.mxu0 %v2420_v23 }
 0xef2   :  { %3559 = vmatprep.subr.mxu0 %v2419_v24 }
 0xef3   :  { %3560 = vmatpush3.msra.mxu0 %v2419_v24 }
 0xf94   :  { %v3493_v59 = vpop.f32.mrf.mxu0 }
 0xf95   :  { %v2295_v61 = vadd.f32 %v3493_v59, %v2592_v58 }
 0xf96   :  { %v2289_v60 = vpop.f32.mrf.mxu0 }
 0xf97   :  { %v2290_v62 = vadd.f32 %v2592_v58, %v2289_v60  ;;  %v2299_v0 = vmax.f32 %v2295_v61, 0.0 }
 0xf99   :  { %v2298_v63 = vmax.f32 %v2290_v62, 0.0 }
 0xf9b   :  { %3526 = vmatprep.mubr.f32.mxu1 %v2298_v63 }
 0xf9c   :  { %3527 = vmatmul.mubr.f32.vlgmr.msra.gmra.mxu1 %v2299_v0 }
0x105c   :  { %v3528_v49 = vpop.f32.mrf.mxu1 }
0x105d   :  { %v2376_v1 = vadd.f32 %v3528_v49, %v2593_v50 }
0x105e   :  { %v2370_v2 = vpop.f32.mrf.mxu1 }
0x105f   :  { %v4044_v3 = vadd.f32 %v2376_v1, %v2218_v53  ;;  %v2371_v5 = vadd.f32 %v2593_v50, %v2370_v2 }
0x1061   :  { %v4046_v6 = vadd.f32 %v2371_v5, %v2217_v51  ;;  %2383 = vadd.xlane.f32.xlu1 %v4044_v3  ;;  %v2388_v7 = vmul.f32 %v4044_v3, %v4044_v3  ;;  %v2596_v51 = vld [vmem:[#allocation8 + $0x80] ss:$0 sm:$0xff] }
0x1063   :  { %2381 = vadd.xlane.f32.xlu0 %v4046_v6  ;;  %v2387_v9 = vmul.f32 %v4046_v6, %v4046_v6 }
0x1065   :  { %2391 = vadd.xlane.f32.xlu1 %v2388_v7 }
0x1067   :  { %2389 = vadd.xlane.f32.xlu0 %v2387_v9 }
0x10ea   :  { %v2384_v25 = vpop.xlane.xlu1 %2383 }
0x10eb   :  { %v2386_v26 = vmul.f32 0.03125, %v2384_v25 }
0x10ec   :  { %v2382_v27 = vpop.xlane.xlu0 %2381 }
0x10ed   :  { %v2385_v28 = vmul.f32 0.03125, %v2382_v27  ;;  %v2396_v31 = vmul.f32 %v2386_v26, %v2386_v26  ;;  %v2400_v40 = vsub.f32 %v4044_v3, %v2386_v26 }
0x10ee   :  { %v2392_v29 = vpop.xlane.xlu1 %2391 }
0x10ef   :  { %v2394_v32 = vmul.f32 0.03125, %v2392_v29  ;;  %v2395_v34 = vmul.f32 %v2385_v28, %v2385_v28  ;;  %v2399_v42 = vsub.f32 %v4046_v6, %v2385_v28 }
0x10f0   :  { %v2390_v33 = vpop.xlane.xlu0 %2389 }
0x10f1   :  { %v2398_v35 = vsub.f32 %v2394_v32, %v2396_v31  ;;  %v2393_v36 = vmul.f32 0.03125, %v2390_v33 }
0x10f3   :  { %v2402_v37 = vadd.f32 1e-05, %v2398_v35  ;;  %v2397_v38 = vsub.f32 %v2393_v36, %v2395_v34 }
0x10f5   :  { %3599 = vrsqrt.f32 %v2402_v37  ;;  %v2401_v39 = vadd.f32 1e-05, %v2397_v38 }
0x10f7   :  { %3601 = vrsqrt.f32 %v2401_v39 }
0x1102   :  { %v3600_v41 = vpop.eup %3599 }
0x1103   :  { %v2406_v44 = vmul.f32 %v3600_v41, %v2400_v40 }
0x1104   :  { %v3602_v45 = vpop.eup %3601 }
0x1105   :  { %v2405_v46 = vmul.f32 %v3602_v45, %v2399_v42  ;;  %v2412_v47 = vmul.f32 %v2594_v43, %v2406_v44 }
0x1107   :  { %v2411_v30 = vmul.f32 %v2594_v43, %v2405_v46  ;;  %v2418_v52 = vadd.f32 %v2595_v48, %v2412_v47 }
0x1109   :  { %v2417_v4 = vadd.f32 %v2595_v48, %v2411_v30 }
0x110b   :  { %3561 = vmatprep.mubr.f32.mxu0 %v2417_v4 }
0x110c   :  { %3562 = vmatmul.mubr.f32.vlgmr.msra.gmra.mxu0 %v2418_v52 }
0x11cc   :  { %v3563_v53 = vpop.f32.mrf.mxu0 }
0x11cd   :  { %v2512_v54 = vadd.f32 %v3563_v53, %v2596_v51 }
0x11ce   :  { %v2506_v55 = vpop.f32.mrf.mxu0 }
0x11cf   :  { %2516 = vst [vmem:[#allocation10 + $0x8] sm:$0xff] %v2512_v54  ;;  %v2507_v56 = vadd.f32 %v2596_v51, %v2506_v55 }
0x11d1   :  { %2515 = vst [vmem:[#allocation10] sm:$0xff] %v2507_v56 }
0x11d2   :  { %3720 = shalt.err (!%p3717_p10)
}
0x11d3   :  { %2528 = dma.vmem_to_hbm [thread:$0]  %s2523_s12, 256, %s4069_s7, [#allocation4], %s3739_s29, %s3739_s29, %s3740_s30  }
0x11d4   :  { %3735 = dma.done.wait [#allocation4], 256  }
0x11d5   :  { %3736 = vsyncadd [#allocation4], 4294967040 }
0x11d6   :  { %2532 = vsyncpa [#allocation3], 1 }
0x11d7   :  { %2533 = vsyncpa [#allocation6], 1 }
0x11d8   :  { %2534 = vsyncpa [#allocation9], 1 }
0x11d9   :  { %2535 = vsyncpa [#allocation4], 1 }

</bundles_post_ra>
